<compile_context>
chip_gen: v7x
topology: tpu7x:2x2x1
jax: 0.10.0
libtpu: 0.0.40
codegen_flags: <defaults>
</compile_context>

<pallas_src>
import jax
import jax.numpy as jnp
from jax import lax
from jax.experimental import pallas as pl
from jax.experimental.pallas import tpu as pltpu


def _nf_kernel(z_ref, w_ref, u_ref, b_ref, z_out_ref, ldj_ref):
    z0 = z_ref[...]                          # (TB, D) f32
    W = w_ref[...]                           # (K, D)  f32
    U = u_ref[...]                           # (K, D)  f32
    K = W.shape[0]
    TB = z0.shape[0]

    # One MXU matmul: projections of z0 onto every flow direction at once.
    # dot_general contracting last dims avoids materializing a transpose.
    L0 = lax.dot_general(
        z0, W, (((1,), (1,)), ((), ())),
        precision=lax.Precision.HIGHEST,
        preferred_element_type=jnp.float32)  # (TB, K)

    # Coupling matrix M[j, k] = u_j . w_k  (diag gives w_k . u_k for ldj).
    M = lax.dot_general(
        U, W, (((1,), (1,)), ((), ())),
        precision=lax.Precision.HIGHEST,
        preferred_element_type=jnp.float32)  # (K, K)

    fs = []
    ldj = jnp.zeros((TB, 1), jnp.float32)

    # K is small & static -> fully unrolled; carried state is only the
    # narrow (TB, 1) f columns, never the full (TB, D) z.
    for k in range(K):
        lin = L0[:, k:k + 1] + b_ref[k]      # scalar bias from SMEM
        for j in range(k):
            lin = lin + fs[j] * M[j, k]      # (TB,1) * scalar
        f_k = jnp.tanh(lin)                  # (TB, 1), EUP
        d_k = M[k, k]                        # w_k . u_k (scalar)
        ldj = ldj + jnp.log(jnp.abs(1.0 + (1.0 - f_k * f_k) * d_k))
        fs.append(f_k)

    F = jnp.concatenate(fs, axis=1)          # (TB, K)
    # Second MXU matmul: apply all K rank-1 updates at once.
    z_out_ref[...] = z0 + jnp.dot(
        F, U, precision=lax.Precision.HIGHEST,
        preferred_element_type=jnp.float32)
    ldj_ref[...] = ldj


def normalizing_flow(z, W, Bias, U, *, block_b=1024):
    """z: (B, D); W, U: (K, D); Bias: (K, 1) or (K,).

    Returns (z_K, sum_k log|det J_k|) with shapes (B, D), (B, 1).
    """
    z = jnp.asarray(z, jnp.float32)
    W = jnp.asarray(W, jnp.float32)
    U = jnp.asarray(U, jnp.float32)
    b_flat = jnp.asarray(Bias, jnp.float32).reshape(-1)   # (K,) for SMEM

    B, D = z.shape
    K = W.shape[0]

    # Batch tile: whole batch if small, otherwise a multiple-of-8 tile.
    if B <= block_b:
        TB = B
    else:
        TB = max(8, (block_b // 8) * 8)
    pad = (-B) % TB
    if pad:
        z = jnp.pad(z, ((0, pad), (0, 0)))
    Bp = B + pad
    grid = (Bp // TB,)

    z_out, ldj = pl.pallas_call(
        _nf_kernel,
        out_shape=(
            jax.ShapeDtypeStruct((Bp, D), jnp.float32),
            jax.ShapeDtypeStruct((Bp, 1), jnp.float32),
        ),
        grid=grid,
        in_specs=[
            pl.BlockSpec((TB, D), lambda i: (i, 0)),     # z tile (pipelined)
            pl.BlockSpec((K, D), lambda i: (0, 0)),      # W resident in VMEM
            pl.BlockSpec((K, D), lambda i: (0, 0)),      # U resident in VMEM
            pl.BlockSpec(memory_space=pltpu.MemorySpace.SMEM),  # bias scalars
        ],
        out_specs=(
            pl.BlockSpec((TB, D), lambda i: (i, 0)),
            pl.BlockSpec((TB, 1), lambda i: (i, 0)),
        ),
        compiler_params=pltpu.CompilerParams(
            dimension_semantics=("parallel",)),          # megacore on v7x
    )(z, W, U, b_flat)

    if pad:
        z_out = z_out[:B]
        ldj = ldj[:B]
    return z_out, ldj


def _reference(z, W, Bias, U):
    """Pure-JAX mirror of the PyTorch module (per-flow, elementwise math)."""
    Bias = Bias.reshape(-1, 1)
    ldj_sum = jnp.zeros((z.shape[0], 1), dtype=jnp.float32)
    for k in range(W.shape[0]):
        w_k, u_k, b_k = W[k:k + 1], U[k:k + 1], Bias[k:k + 1]
        lin = jnp.sum(z * w_k, axis=-1, keepdims=True) + b_k
        f = jnp.tanh(lin)
        z = z + u_k * f
        psi = (1.0 - f ** 2) * w_k
        dot = jnp.sum(psi * u_k, axis=-1, keepdims=True)
        ldj_sum = ldj_sum + jnp.log(jnp.abs(1.0 + dot))
    return z, ldj_sum


if __name__ == "__main__":
    latent_size = 10
    K = 10
    batch = 8

    key = jax.random.PRNGKey(0)
    kz, kw, kb, ku = jax.random.split(key, 4)

    # Deterministic "parameters": normal(0, 0.02), matching the module init.
    z = jax.random.normal(kz, (batch, latent_size), dtype=jnp.float32)
    W = 0.02 * jax.random.normal(kw, (K, latent_size), dtype=jnp.float32)
    Bias = 0.02 * jax.random.normal(kb, (K, 1), dtype=jnp.float32)
    U = 0.02 * jax.random.normal(ku, (K, latent_size), dtype=jnp.float32)

    z_out, ldj = jax.block_until_ready(normalizing_flow(z, W, Bias, U))

    z_ref, ldj_ref = _reference(z, W, Bias, U)
    assert jnp.allclose(z_out, z_ref, atol=1e-5), "z mismatch"
    assert jnp.allclose(ldj, ldj_ref, atol=1e-5), "logdet mismatch"

    print("KERNEL_OK")
</pallas_src>

<mosaic_0001>
module attributes {stable_mosaic.version = 11 : i64} {
  func.func @_nf_kernel(%arg0: i32, %arg1: memref<8x10xf32, #tpu.memory_space<vmem>>, %arg2: memref<10x10xf32, #tpu.memory_space<vmem>>, %arg3: memref<10x10xf32, #tpu.memory_space<vmem>>, %arg4: memref<10xf32, #tpu.memory_space<smem>>, %arg5: memref<8x10xf32, #tpu.memory_space<vmem>>, %arg6: memref<8x1xf32, #tpu.memory_space<vmem>>) attributes {dimension_semantics = [#tpu.dimension_semantics<parallel>], iteration_bounds = array<i64: 1>, scalar_prefetch = 0 : i64, scratch_operands = 0 : i64, tpu.core_type = #tpu.core_type<tc>, window_params = [{transform_indices = @transform_0, window_bounds = array<i64: 8, 10>}, {pipeline_mode = #tpu.pipeline_mode<synchronous>, transform_indices = @transform_1, window_bounds = array<i64: 10, 10>}, {pipeline_mode = #tpu.pipeline_mode<synchronous>, transform_indices = @transform_2, window_bounds = array<i64: 10, 10>}, {transform_indices = @transform_3, window_bounds = array<i64: 10>}, {transform_indices = @transform_4, window_bounds = array<i64: 8, 10>}, {transform_indices = @transform_5, window_bounds = array<i64: 8, 1>}]} {
    %c0 = arith.constant 0 : index
    %c0_0 = arith.constant 0 : index
    %0 = vector.load %arg1[%c0, %c0_0] : memref<8x10xf32, #tpu.memory_space<vmem>>, vector<8x10xf32>
    %c0_1 = arith.constant 0 : index
    %c0_2 = arith.constant 0 : index
    %1 = vector.load %arg2[%c0_1, %c0_2] : memref<10x10xf32, #tpu.memory_space<vmem>>, vector<10x10xf32>
    %c0_3 = arith.constant 0 : index
    %c0_4 = arith.constant 0 : index
    %2 = vector.load %arg3[%c0_3, %c0_4] : memref<10x10xf32, #tpu.memory_space<vmem>>, vector<10x10xf32>
    %cst = arith.constant dense<0.000000e+00> : vector<8x10xf32>
    %3 = tpu.matmul %0, %1, %cst {dimension_numbers = #tpu.dot_dimension_numbers<[1], [1], [0], [0], [0, 0, 1, 0], [], []>, precision = #tpu.contract_precision<fp32>} : vector<8x10xf32>, vector<10x10xf32>, vector<8x10xf32> -> vector<8x10xf32>
    %cst_5 = arith.constant dense<0.000000e+00> : vector<10x10xf32>
    %4 = tpu.matmul %2, %1, %cst_5 {dimension_numbers = #tpu.dot_dimension_numbers<[1], [1], [0], [0], [0, 0, 1, 0], [], []>, precision = #tpu.contract_precision<fp32>} : vector<10x10xf32>, vector<10x10xf32>, vector<10x10xf32> -> vector<10x10xf32>
    %cst_6 = arith.constant 0.000000e+00 : f32
    %5 = vector.broadcast %cst_6 : f32 to vector<8x1xf32>
    %6 = vector.extract_strided_slice %3 {offsets = [0, 0], sizes = [8, 1], strides = [1, 1]} : vector<8x10xf32> to vector<8x1xf32>
    %c0_7 = arith.constant 0 : index
    %7 = memref.load %arg4[%c0_7] : memref<10xf32, #tpu.memory_space<smem>>
    %8 = vector.broadcast %7 : f32 to vector<8x1xf32>
    %9 = arith.addf %6, %8 : vector<8x1xf32>
    %10 = math.tanh %9 : vector<8x1xf32>
    %11 = vector.extract_strided_slice %4 {offsets = [0, 0], sizes = [1, 1], strides = [1, 1]} : vector<10x10xf32> to vector<1x1xf32>
    %12 = vector.extract %11[0, 0] : f32 from vector<1x1xf32>
    %13 = arith.mulf %10, %10 : vector<8x1xf32>
    %cst_8 = arith.constant 1.000000e+00 : f32
    %14 = vector.broadcast %cst_8 : f32 to vector<8x1xf32>
    %15 = arith.subf %14, %13 : vector<8x1xf32>
    %16 = vector.broadcast %12 : f32 to vector<8x1xf32>
    %17 = arith.mulf %15, %16 : vector<8x1xf32>
    %cst_9 = arith.constant 1.000000e+00 : f32
    %18 = vector.broadcast %cst_9 : f32 to vector<8x1xf32>
    %19 = arith.addf %18, %17 : vector<8x1xf32>
    %20 = math.absf %19 : vector<8x1xf32>
    %21 = math.log %20 : vector<8x1xf32>
    %22 = arith.addf %5, %21 : vector<8x1xf32>
    %23 = vector.extract_strided_slice %3 {offsets = [0, 1], sizes = [8, 1], strides = [1, 1]} : vector<8x10xf32> to vector<8x1xf32>
    %c1 = arith.constant 1 : index
    %24 = memref.load %arg4[%c1] : memref<10xf32, #tpu.memory_space<smem>>
    %25 = vector.broadcast %24 : f32 to vector<8x1xf32>
    %26 = arith.addf %23, %25 : vector<8x1xf32>
    %27 = vector.extract_strided_slice %4 {offsets = [0, 1], sizes = [1, 1], strides = [1, 1]} : vector<10x10xf32> to vector<1x1xf32>
    %28 = vector.extract %27[0, 0] : f32 from vector<1x1xf32>
    %29 = vector.broadcast %28 : f32 to vector<8x1xf32>
    %30 = arith.mulf %10, %29 : vector<8x1xf32>
    %31 = arith.addf %26, %30 : vector<8x1xf32>
    %32 = math.tanh %31 : vector<8x1xf32>
    %33 = vector.extract_strided_slice %4 {offsets = [1, 1], sizes = [1, 1], strides = [1, 1]} : vector<10x10xf32> to vector<1x1xf32>
    %34 = vector.extract %33[0, 0] : f32 from vector<1x1xf32>
    %35 = arith.mulf %32, %32 : vector<8x1xf32>
    %cst_10 = arith.constant 1.000000e+00 : f32
    %36 = vector.broadcast %cst_10 : f32 to vector<8x1xf32>
    %37 = arith.subf %36, %35 : vector<8x1xf32>
    %38 = vector.broadcast %34 : f32 to vector<8x1xf32>
    %39 = arith.mulf %37, %38 : vector<8x1xf32>
    %cst_11 = arith.constant 1.000000e+00 : f32
    %40 = vector.broadcast %cst_11 : f32 to vector<8x1xf32>
    %41 = arith.addf %40, %39 : vector<8x1xf32>
    %42 = math.absf %41 : vector<8x1xf32>
    %43 = math.log %42 : vector<8x1xf32>
    %44 = arith.addf %22, %43 : vector<8x1xf32>
    %45 = vector.extract_strided_slice %3 {offsets = [0, 2], sizes = [8, 1], strides = [1, 1]} : vector<8x10xf32> to vector<8x1xf32>
    %c2 = arith.constant 2 : index
    %46 = memref.load %arg4[%c2] : memref<10xf32, #tpu.memory_space<smem>>
    %47 = vector.broadcast %46 : f32 to vector<8x1xf32>
    %48 = arith.addf %45, %47 : vector<8x1xf32>
    %49 = vector.extract_strided_slice %4 {offsets = [0, 2], sizes = [1, 1], strides = [1, 1]} : vector<10x10xf32> to vector<1x1xf32>
    %50 = vector.extract %49[0, 0] : f32 from vector<1x1xf32>
    %51 = vector.broadcast %50 : f32 to vector<8x1xf32>
    %52 = arith.mulf %10, %51 : vector<8x1xf32>
    %53 = arith.addf %48, %52 : vector<8x1xf32>
    %54 = vector.extract_strided_slice %4 {offsets = [1, 2], sizes = [1, 1], strides = [1, 1]} : vector<10x10xf32> to vector<1x1xf32>
    %55 = vector.extract %54[0, 0] : f32 from vector<1x1xf32>
    %56 = vector.broadcast %55 : f32 to vector<8x1xf32>
    %57 = arith.mulf %32, %56 : vector<8x1xf32>
    %58 = arith.addf %53, %57 : vector<8x1xf32>
    %59 = math.tanh %58 : vector<8x1xf32>
    %60 = vector.extract_strided_slice %4 {offsets = [2, 2], sizes = [1, 1], strides = [1, 1]} : vector<10x10xf32> to vector<1x1xf32>
    %61 = vector.extract %60[0, 0] : f32 from vector<1x1xf32>
    %62 = arith.mulf %59, %59 : vector<8x1xf32>
    %cst_12 = arith.constant 1.000000e+00 : f32
    %63 = vector.broadcast %cst_12 : f32 to vector<8x1xf32>
    %64 = arith.subf %63, %62 : vector<8x1xf32>
    %65 = vector.broadcast %61 : f32 to vector<8x1xf32>
    %66 = arith.mulf %64, %65 : vector<8x1xf32>
    %cst_13 = arith.constant 1.000000e+00 : f32
    %67 = vector.broadcast %cst_13 : f32 to vector<8x1xf32>
    %68 = arith.addf %67, %66 : vector<8x1xf32>
    %69 = math.absf %68 : vector<8x1xf32>
    %70 = math.log %69 : vector<8x1xf32>
    %71 = arith.addf %44, %70 : vector<8x1xf32>
    %72 = vector.extract_strided_slice %3 {offsets = [0, 3], sizes = [8, 1], strides = [1, 1]} : vector<8x10xf32> to vector<8x1xf32>
    %c3 = arith.constant 3 : index
    %73 = memref.load %arg4[%c3] : memref<10xf32, #tpu.memory_space<smem>>
    %74 = vector.broadcast %73 : f32 to vector<8x1xf32>
    %75 = arith.addf %72, %74 : vector<8x1xf32>
    %76 = vector.extract_strided_slice %4 {offsets = [0, 3], sizes = [1, 1], strides = [1, 1]} : vector<10x10xf32> to vector<1x1xf32>
    %77 = vector.extract %76[0, 0] : f32 from vector<1x1xf32>
    %78 = vector.broadcast %77 : f32 to vector<8x1xf32>
    %79 = arith.mulf %10, %78 : vector<8x1xf32>
    %80 = arith.addf %75, %79 : vector<8x1xf32>
    %81 = vector.extract_strided_slice %4 {offsets = [1, 3], sizes = [1, 1], strides = [1, 1]} : vector<10x10xf32> to vector<1x1xf32>
    %82 = vector.extract %81[0, 0] : f32 from vector<1x1xf32>
    %83 = vector.broadcast %82 : f32 to vector<8x1xf32>
    %84 = arith.mulf %32, %83 : vector<8x1xf32>
    %85 = arith.addf %80, %84 : vector<8x1xf32>
    %86 = vector.extract_strided_slice %4 {offsets = [2, 3], sizes = [1, 1], strides = [1, 1]} : vector<10x10xf32> to vector<1x1xf32>
    %87 = vector.extract %86[0, 0] : f32 from vector<1x1xf32>
    %88 = vector.broadcast %87 : f32 to vector<8x1xf32>
    %89 = arith.mulf %59, %88 : vector<8x1xf32>
    %90 = arith.addf %85, %89 : vector<8x1xf32>
    %91 = math.tanh %90 : vector<8x1xf32>
    %92 = vector.extract_strided_slice %4 {offsets = [3, 3], sizes = [1, 1], strides = [1, 1]} : vector<10x10xf32> to vector<1x1xf32>
    %93 = vector.extract %92[0, 0] : f32 from vector<1x1xf32>
    %94 = arith.mulf %91, %91 : vector<8x1xf32>
    %cst_14 = arith.constant 1.000000e+00 : f32
    %95 = vector.broadcast %cst_14 : f32 to vector<8x1xf32>
    %96 = arith.subf %95, %94 : vector<8x1xf32>
    %97 = vector.broadcast %93 : f32 to vector<8x1xf32>
    %98 = arith.mulf %96, %97 : vector<8x1xf32>
    %cst_15 = arith.constant 1.000000e+00 : f32
    %99 = vector.broadcast %cst_15 : f32 to vector<8x1xf32>
    %100 = arith.addf %99, %98 : vector<8x1xf32>
    %101 = math.absf %100 : vector<8x1xf32>
    %102 = math.log %101 : vector<8x1xf32>
    %103 = arith.addf %71, %102 : vector<8x1xf32>
    %104 = vector.extract_strided_slice %3 {offsets = [0, 4], sizes = [8, 1], strides = [1, 1]} : vector<8x10xf32> to vector<8x1xf32>
    %c4 = arith.constant 4 : index
    %105 = memref.load %arg4[%c4] : memref<10xf32, #tpu.memory_space<smem>>
    %106 = vector.broadcast %105 : f32 to vector<8x1xf32>
    %107 = arith.addf %104, %106 : vector<8x1xf32>
    %108 = vector.extract_strided_slice %4 {offsets = [0, 4], sizes = [1, 1], strides = [1, 1]} : vector<10x10xf32> to vector<1x1xf32>
    %109 = vector.extract %108[0, 0] : f32 from vector<1x1xf32>
    %110 = vector.broadcast %109 : f32 to vector<8x1xf32>
    %111 = arith.mulf %10, %110 : vector<8x1xf32>
    %112 = arith.addf %107, %111 : vector<8x1xf32>
    %113 = vector.extract_strided_slice %4 {offsets = [1, 4], sizes = [1, 1], strides = [1, 1]} : vector<10x10xf32> to vector<1x1xf32>
    %114 = vector.extract %113[0, 0] : f32 from vector<1x1xf32>
    %115 = vector.broadcast %114 : f32 to vector<8x1xf32>
    %116 = arith.mulf %32, %115 : vector<8x1xf32>
    %117 = arith.addf %112, %116 : vector<8x1xf32>
    %118 = vector.extract_strided_slice %4 {offsets = [2, 4], sizes = [1, 1], strides = [1, 1]} : vector<10x10xf32> to vector<1x1xf32>
    %119 = vector.extract %118[0, 0] : f32 from vector<1x1xf32>
    %120 = vector.broadcast %119 : f32 to vector<8x1xf32>
    %121 = arith.mulf %59, %120 : vector<8x1xf32>
    %122 = arith.addf %117, %121 : vector<8x1xf32>
    %123 = vector.extract_strided_slice %4 {offsets = [3, 4], sizes = [1, 1], strides = [1, 1]} : vector<10x10xf32> to vector<1x1xf32>
    %124 = vector.extract %123[0, 0] : f32 from vector<1x1xf32>
    %125 = vector.broadcast %124 : f32 to vector<8x1xf32>
    %126 = arith.mulf %91, %125 : vector<8x1xf32>
    %127 = arith.addf %122, %126 : vector<8x1xf32>
    %128 = math.tanh %127 : vector<8x1xf32>
    %129 = vector.extract_strided_slice %4 {offsets = [4, 4], sizes = [1, 1], strides = [1, 1]} : vector<10x10xf32> to vector<1x1xf32>
    %130 = vector.extract %129[0, 0] : f32 from vector<1x1xf32>
    %131 = arith.mulf %128, %128 : vector<8x1xf32>
    %cst_16 = arith.constant 1.000000e+00 : f32
    %132 = vector.broadcast %cst_16 : f32 to vector<8x1xf32>
    %133 = arith.subf %132, %131 : vector<8x1xf32>
    %134 = vector.broadcast %130 : f32 to vector<8x1xf32>
    %135 = arith.mulf %133, %134 : vector<8x1xf32>
    %cst_17 = arith.constant 1.000000e+00 : f32
    %136 = vector.broadcast %cst_17 : f32 to vector<8x1xf32>
    %137 = arith.addf %136, %135 : vector<8x1xf32>
    %138 = math.absf %137 : vector<8x1xf32>
    %139 = math.log %138 : vector<8x1xf32>
    %140 = arith.addf %103, %139 : vector<8x1xf32>
    %141 = vector.extract_strided_slice %3 {offsets = [0, 5], sizes = [8, 1], strides = [1, 1]} : vector<8x10xf32> to vector<8x1xf32>
    %c5 = arith.constant 5 : index
    %142 = memref.load %arg4[%c5] : memref<10xf32, #tpu.memory_space<smem>>
    %143 = vector.broadcast %142 : f32 to vector<8x1xf32>
    %144 = arith.addf %141, %143 : vector<8x1xf32>
    %145 = vector.extract_strided_slice %4 {offsets = [0, 5], sizes = [1, 1], strides = [1, 1]} : vector<10x10xf32> to vector<1x1xf32>
    %146 = vector.extract %145[0, 0] : f32 from vector<1x1xf32>
    %147 = vector.broadcast %146 : f32 to vector<8x1xf32>
    %148 = arith.mulf %10, %147 : vector<8x1xf32>
    %149 = arith.addf %144, %148 : vector<8x1xf32>
    %150 = vector.extract_strided_slice %4 {offsets = [1, 5], sizes = [1, 1], strides = [1, 1]} : vector<10x10xf32> to vector<1x1xf32>
    %151 = vector.extract %150[0, 0] : f32 from vector<1x1xf32>
    %152 = vector.broadcast %151 : f32 to vector<8x1xf32>
    %153 = arith.mulf %32, %152 : vector<8x1xf32>
    %154 = arith.addf %149, %153 : vector<8x1xf32>
    %155 = vector.extract_strided_slice %4 {offsets = [2, 5], sizes = [1, 1], strides = [1, 1]} : vector<10x10xf32> to vector<1x1xf32>
    %156 = vector.extract %155[0, 0] : f32 from vector<1x1xf32>
    %157 = vector.broadcast %156 : f32 to vector<8x1xf32>
    %158 = arith.mulf %59, %157 : vector<8x1xf32>
    %159 = arith.addf %154, %158 : vector<8x1xf32>
    %160 = vector.extract_strided_slice %4 {offsets = [3, 5], sizes = [1, 1], strides = [1, 1]} : vector<10x10xf32> to vector<1x1xf32>
    %161 = vector.extract %160[0, 0] : f32 from vector<1x1xf32>
    %162 = vector.broadcast %161 : f32 to vector<8x1xf32>
    %163 = arith.mulf %91, %162 : vector<8x1xf32>
    %164 = arith.addf %159, %163 : vector<8x1xf32>
    %165 = vector.extract_strided_slice %4 {offsets = [4, 5], sizes = [1, 1], strides = [1, 1]} : vector<10x10xf32> to vector<1x1xf32>
    %166 = vector.extract %165[0, 0] : f32 from vector<1x1xf32>
    %167 = vector.broadcast %166 : f32 to vector<8x1xf32>
    %168 = arith.mulf %128, %167 : vector<8x1xf32>
    %169 = arith.addf %164, %168 : vector<8x1xf32>
    %170 = math.tanh %169 : vector<8x1xf32>
    %171 = vector.extract_strided_slice %4 {offsets = [5, 5], sizes = [1, 1], strides = [1, 1]} : vector<10x10xf32> to vector<1x1xf32>
    %172 = vector.extract %171[0, 0] : f32 from vector<1x1xf32>
    %173 = arith.mulf %170, %170 : vector<8x1xf32>
    %cst_18 = arith.constant 1.000000e+00 : f32
    %174 = vector.broadcast %cst_18 : f32 to vector<8x1xf32>
    %175 = arith.subf %174, %173 : vector<8x1xf32>
    %176 = vector.broadcast %172 : f32 to vector<8x1xf32>
    %177 = arith.mulf %175, %176 : vector<8x1xf32>
    %cst_19 = arith.constant 1.000000e+00 : f32
    %178 = vector.broadcast %cst_19 : f32 to vector<8x1xf32>
    %179 = arith.addf %178, %177 : vector<8x1xf32>
    %180 = math.absf %179 : vector<8x1xf32>
    %181 = math.log %180 : vector<8x1xf32>
    %182 = arith.addf %140, %181 : vector<8x1xf32>
    %183 = vector.extract_strided_slice %3 {offsets = [0, 6], sizes = [8, 1], strides = [1, 1]} : vector<8x10xf32> to vector<8x1xf32>
    %c6 = arith.constant 6 : index
    %184 = memref.load %arg4[%c6] : memref<10xf32, #tpu.memory_space<smem>>
    %185 = vector.broadcast %184 : f32 to vector<8x1xf32>
    %186 = arith.addf %183, %185 : vector<8x1xf32>
    %187 = vector.extract_strided_slice %4 {offsets = [0, 6], sizes = [1, 1], strides = [1, 1]} : vector<10x10xf32> to vector<1x1xf32>
    %188 = vector.extract %187[0, 0] : f32 from vector<1x1xf32>
    %189 = vector.broadcast %188 : f32 to vector<8x1xf32>
    %190 = arith.mulf %10, %189 : vector<8x1xf32>
    %191 = arith.addf %186, %190 : vector<8x1xf32>
    %192 = vector.extract_strided_slice %4 {offsets = [1, 6], sizes = [1, 1], strides = [1, 1]} : vector<10x10xf32> to vector<1x1xf32>
    %193 = vector.extract %192[0, 0] : f32 from vector<1x1xf32>
    %194 = vector.broadcast %193 : f32 to vector<8x1xf32>
    %195 = arith.mulf %32, %194 : vector<8x1xf32>
    %196 = arith.addf %191, %195 : vector<8x1xf32>
    %197 = vector.extract_strided_slice %4 {offsets = [2, 6], sizes = [1, 1], strides = [1, 1]} : vector<10x10xf32> to vector<1x1xf32>
    %198 = vector.extract %197[0, 0] : f32 from vector<1x1xf32>
    %199 = vector.broadcast %198 : f32 to vector<8x1xf32>
    %200 = arith.mulf %59, %199 : vector<8x1xf32>
    %201 = arith.addf %196, %200 : vector<8x1xf32>
    %202 = vector.extract_strided_slice %4 {offsets = [3, 6], sizes = [1, 1], strides = [1, 1]} : vector<10x10xf32> to vector<1x1xf32>
    %203 = vector.extract %202[0, 0] : f32 from vector<1x1xf32>
    %204 = vector.broadcast %203 : f32 to vector<8x1xf32>
    %205 = arith.mulf %91, %204 : vector<8x1xf32>
    %206 = arith.addf %201, %205 : vector<8x1xf32>
    %207 = vector.extract_strided_slice %4 {offsets = [4, 6], sizes = [1, 1], strides = [1, 1]} : vector<10x10xf32> to vector<1x1xf32>
    %208 = vector.extract %207[0, 0] : f32 from vector<1x1xf32>
    %209 = vector.broadcast %208 : f32 to vector<8x1xf32>
    %210 = arith.mulf %128, %209 : vector<8x1xf32>
    %211 = arith.addf %206, %210 : vector<8x1xf32>
    %212 = vector.extract_strided_slice %4 {offsets = [5, 6], sizes = [1, 1], strides = [1, 1]} : vector<10x10xf32> to vector<1x1xf32>
    %213 = vector.extract %212[0, 0] : f32 from vector<1x1xf32>
    %214 = vector.broadcast %213 : f32 to vector<8x1xf32>
    %215 = arith.mulf %170, %214 : vector<8x1xf32>
    %216 = arith.addf %211, %215 : vector<8x1xf32>
    %217 = math.tanh %216 : vector<8x1xf32>
    %218 = vector.extract_strided_slice %4 {offsets = [6, 6], sizes = [1, 1], strides = [1, 1]} : vector<10x10xf32> to vector<1x1xf32>
    %219 = vector.extract %218[0, 0] : f32 from vector<1x1xf32>
    %220 = arith.mulf %217, %217 : vector<8x1xf32>
    %cst_20 = arith.constant 1.000000e+00 : f32
    %221 = vector.broadcast %cst_20 : f32 to vector<8x1xf32>
    %222 = arith.subf %221, %220 : vector<8x1xf32>
    %223 = vector.broadcast %219 : f32 to vector<8x1xf32>
    %224 = arith.mulf %222, %223 : vector<8x1xf32>
    %cst_21 = arith.constant 1.000000e+00 : f32
    %225 = vector.broadcast %cst_21 : f32 to vector<8x1xf32>
    %226 = arith.addf %225, %224 : vector<8x1xf32>
    %227 = math.absf %226 : vector<8x1xf32>
    %228 = math.log %227 : vector<8x1xf32>
    %229 = arith.addf %182, %228 : vector<8x1xf32>
    %230 = vector.extract_strided_slice %3 {offsets = [0, 7], sizes = [8, 1], strides = [1, 1]} : vector<8x10xf32> to vector<8x1xf32>
    %c7 = arith.constant 7 : index
    %231 = memref.load %arg4[%c7] : memref<10xf32, #tpu.memory_space<smem>>
    %232 = vector.broadcast %231 : f32 to vector<8x1xf32>
    %233 = arith.addf %230, %232 : vector<8x1xf32>
    %234 = vector.extract_strided_slice %4 {offsets = [0, 7], sizes = [1, 1], strides = [1, 1]} : vector<10x10xf32> to vector<1x1xf32>
    %235 = vector.extract %234[0, 0] : f32 from vector<1x1xf32>
    %236 = vector.broadcast %235 : f32 to vector<8x1xf32>
    %237 = arith.mulf %10, %236 : vector<8x1xf32>
    %238 = arith.addf %233, %237 : vector<8x1xf32>
    %239 = vector.extract_strided_slice %4 {offsets = [1, 7], sizes = [1, 1], strides = [1, 1]} : vector<10x10xf32> to vector<1x1xf32>
    %240 = vector.extract %239[0, 0] : f32 from vector<1x1xf32>
    %241 = vector.broadcast %240 : f32 to vector<8x1xf32>
    %242 = arith.mulf %32, %241 : vector<8x1xf32>
    %243 = arith.addf %238, %242 : vector<8x1xf32>
    %244 = vector.extract_strided_slice %4 {offsets = [2, 7], sizes = [1, 1], strides = [1, 1]} : vector<10x10xf32> to vector<1x1xf32>
    %245 = vector.extract %244[0, 0] : f32 from vector<1x1xf32>
    %246 = vector.broadcast %245 : f32 to vector<8x1xf32>
    %247 = arith.mulf %59, %246 : vector<8x1xf32>
    %248 = arith.addf %243, %247 : vector<8x1xf32>
    %249 = vector.extract_strided_slice %4 {offsets = [3, 7], sizes = [1, 1], strides = [1, 1]} : vector<10x10xf32> to vector<1x1xf32>
    %250 = vector.extract %249[0, 0] : f32 from vector<1x1xf32>
    %251 = vector.broadcast %250 : f32 to vector<8x1xf32>
    %252 = arith.mulf %91, %251 : vector<8x1xf32>
    %253 = arith.addf %248, %252 : vector<8x1xf32>
    %254 = vector.extract_strided_slice %4 {offsets = [4, 7], sizes = [1, 1], strides = [1, 1]} : vector<10x10xf32> to vector<1x1xf32>
    %255 = vector.extract %254[0, 0] : f32 from vector<1x1xf32>
    %256 = vector.broadcast %255 : f32 to vector<8x1xf32>
    %257 = arith.mulf %128, %256 : vector<8x1xf32>
    %258 = arith.addf %253, %257 : vector<8x1xf32>
    %259 = vector.extract_strided_slice %4 {offsets = [5, 7], sizes = [1, 1], strides = [1, 1]} : vector<10x10xf32> to vector<1x1xf32>
    %260 = vector.extract %259[0, 0] : f32 from vector<1x1xf32>
    %261 = vector.broadcast %260 : f32 to vector<8x1xf32>
    %262 = arith.mulf %170, %261 : vector<8x1xf32>
    %263 = arith.addf %258, %262 : vector<8x1xf32>
    %264 = vector.extract_strided_slice %4 {offsets = [6, 7], sizes = [1, 1], strides = [1, 1]} : vector<10x10xf32> to vector<1x1xf32>
    %265 = vector.extract %264[0, 0] : f32 from vector<1x1xf32>
    %266 = vector.broadcast %265 : f32 to vector<8x1xf32>
    %267 = arith.mulf %217, %266 : vector<8x1xf32>
    %268 = arith.addf %263, %267 : vector<8x1xf32>
    %269 = math.tanh %268 : vector<8x1xf32>
    %270 = vector.extract_strided_slice %4 {offsets = [7, 7], sizes = [1, 1], strides = [1, 1]} : vector<10x10xf32> to vector<1x1xf32>
    %271 = vector.extract %270[0, 0] : f32 from vector<1x1xf32>
    %272 = arith.mulf %269, %269 : vector<8x1xf32>
    %cst_22 = arith.constant 1.000000e+00 : f32
    %273 = vector.broadcast %cst_22 : f32 to vector<8x1xf32>
    %274 = arith.subf %273, %272 : vector<8x1xf32>
    %275 = vector.broadcast %271 : f32 to vector<8x1xf32>
    %276 = arith.mulf %274, %275 : vector<8x1xf32>
    %cst_23 = arith.constant 1.000000e+00 : f32
    %277 = vector.broadcast %cst_23 : f32 to vector<8x1xf32>
    %278 = arith.addf %277, %276 : vector<8x1xf32>
    %279 = math.absf %278 : vector<8x1xf32>
    %280 = math.log %279 : vector<8x1xf32>
    %281 = arith.addf %229, %280 : vector<8x1xf32>
    %282 = vector.extract_strided_slice %3 {offsets = [0, 8], sizes = [8, 1], strides = [1, 1]} : vector<8x10xf32> to vector<8x1xf32>
    %c8 = arith.constant 8 : index
    %283 = memref.load %arg4[%c8] : memref<10xf32, #tpu.memory_space<smem>>
    %284 = vector.broadcast %283 : f32 to vector<8x1xf32>
    %285 = arith.addf %282, %284 : vector<8x1xf32>
    %286 = vector.extract_strided_slice %4 {offsets = [0, 8], sizes = [1, 1], strides = [1, 1]} : vector<10x10xf32> to vector<1x1xf32>
    %287 = vector.extract %286[0, 0] : f32 from vector<1x1xf32>
    %288 = vector.broadcast %287 : f32 to vector<8x1xf32>
    %289 = arith.mulf %10, %288 : vector<8x1xf32>
    %290 = arith.addf %285, %289 : vector<8x1xf32>
    %291 = vector.extract_strided_slice %4 {offsets = [1, 8], sizes = [1, 1], strides = [1, 1]} : vector<10x10xf32> to vector<1x1xf32>
    %292 = vector.extract %291[0, 0] : f32 from vector<1x1xf32>
    %293 = vector.broadcast %292 : f32 to vector<8x1xf32>
    %294 = arith.mulf %32, %293 : vector<8x1xf32>
    %295 = arith.addf %290, %294 : vector<8x1xf32>
    %296 = vector.extract_strided_slice %4 {offsets = [2, 8], sizes = [1, 1], strides = [1, 1]} : vector<10x10xf32> to vector<1x1xf32>
    %297 = vector.extract %296[0, 0] : f32 from vector<1x1xf32>
    %298 = vector.broadcast %297 : f32 to vector<8x1xf32>
    %299 = arith.mulf %59, %298 : vector<8x1xf32>
    %300 = arith.addf %295, %299 : vector<8x1xf32>
    %301 = vector.extract_strided_slice %4 {offsets = [3, 8], sizes = [1, 1], strides = [1, 1]} : vector<10x10xf32> to vector<1x1xf32>
    %302 = vector.extract %301[0, 0] : f32 from vector<1x1xf32>
    %303 = vector.broadcast %302 : f32 to vector<8x1xf32>
    %304 = arith.mulf %91, %303 : vector<8x1xf32>
    %305 = arith.addf %300, %304 : vector<8x1xf32>
    %306 = vector.extract_strided_slice %4 {offsets = [4, 8], sizes = [1, 1], strides = [1, 1]} : vector<10x10xf32> to vector<1x1xf32>
    %307 = vector.extract %306[0, 0] : f32 from vector<1x1xf32>
    %308 = vector.broadcast %307 : f32 to vector<8x1xf32>
    %309 = arith.mulf %128, %308 : vector<8x1xf32>
    %310 = arith.addf %305, %309 : vector<8x1xf32>
    %311 = vector.extract_strided_slice %4 {offsets = [5, 8], sizes = [1, 1], strides = [1, 1]} : vector<10x10xf32> to vector<1x1xf32>
    %312 = vector.extract %311[0, 0] : f32 from vector<1x1xf32>
    %313 = vector.broadcast %312 : f32 to vector<8x1xf32>
    %314 = arith.mulf %170, %313 : vector<8x1xf32>
    %315 = arith.addf %310, %314 : vector<8x1xf32>
    %316 = vector.extract_strided_slice %4 {offsets = [6, 8], sizes = [1, 1], strides = [1, 1]} : vector<10x10xf32> to vector<1x1xf32>
    %317 = vector.extract %316[0, 0] : f32 from vector<1x1xf32>
    %318 = vector.broadcast %317 : f32 to vector<8x1xf32>
    %319 = arith.mulf %217, %318 : vector<8x1xf32>
    %320 = arith.addf %315, %319 : vector<8x1xf32>
    %321 = vector.extract_strided_slice %4 {offsets = [7, 8], sizes = [1, 1], strides = [1, 1]} : vector<10x10xf32> to vector<1x1xf32>
    %322 = vector.extract %321[0, 0] : f32 from vector<1x1xf32>
    %323 = vector.broadcast %322 : f32 to vector<8x1xf32>
    %324 = arith.mulf %269, %323 : vector<8x1xf32>
    %325 = arith.addf %320, %324 : vector<8x1xf32>
    %326 = math.tanh %325 : vector<8x1xf32>
    %327 = vector.extract_strided_slice %4 {offsets = [8, 8], sizes = [1, 1], strides = [1, 1]} : vector<10x10xf32> to vector<1x1xf32>
    %328 = vector.extract %327[0, 0] : f32 from vector<1x1xf32>
    %329 = arith.mulf %326, %326 : vector<8x1xf32>
    %cst_24 = arith.constant 1.000000e+00 : f32
    %330 = vector.broadcast %cst_24 : f32 to vector<8x1xf32>
    %331 = arith.subf %330, %329 : vector<8x1xf32>
    %332 = vector.broadcast %328 : f32 to vector<8x1xf32>
    %333 = arith.mulf %331, %332 : vector<8x1xf32>
    %cst_25 = arith.constant 1.000000e+00 : f32
    %334 = vector.broadcast %cst_25 : f32 to vector<8x1xf32>
    %335 = arith.addf %334, %333 : vector<8x1xf32>
    %336 = math.absf %335 : vector<8x1xf32>
    %337 = math.log %336 : vector<8x1xf32>
    %338 = arith.addf %281, %337 : vector<8x1xf32>
    %339 = vector.extract_strided_slice %3 {offsets = [0, 9], sizes = [8, 1], strides = [1, 1]} : vector<8x10xf32> to vector<8x1xf32>
    %c9 = arith.constant 9 : index
    %340 = memref.load %arg4[%c9] : memref<10xf32, #tpu.memory_space<smem>>
    %341 = vector.broadcast %340 : f32 to vector<8x1xf32>
    %342 = arith.addf %339, %341 : vector<8x1xf32>
    %343 = vector.extract_strided_slice %4 {offsets = [0, 9], sizes = [1, 1], strides = [1, 1]} : vector<10x10xf32> to vector<1x1xf32>
    %344 = vector.extract %343[0, 0] : f32 from vector<1x1xf32>
    %345 = vector.broadcast %344 : f32 to vector<8x1xf32>
    %346 = arith.mulf %10, %345 : vector<8x1xf32>
    %347 = arith.addf %342, %346 : vector<8x1xf32>
    %348 = vector.extract_strided_slice %4 {offsets = [1, 9], sizes = [1, 1], strides = [1, 1]} : vector<10x10xf32> to vector<1x1xf32>
    %349 = vector.extract %348[0, 0] : f32 from vector<1x1xf32>
    %350 = vector.broadcast %349 : f32 to vector<8x1xf32>
    %351 = arith.mulf %32, %350 : vector<8x1xf32>
    %352 = arith.addf %347, %351 : vector<8x1xf32>
    %353 = vector.extract_strided_slice %4 {offsets = [2, 9], sizes = [1, 1], strides = [1, 1]} : vector<10x10xf32> to vector<1x1xf32>
    %354 = vector.extract %353[0, 0] : f32 from vector<1x1xf32>
    %355 = vector.broadcast %354 : f32 to vector<8x1xf32>
    %356 = arith.mulf %59, %355 : vector<8x1xf32>
    %357 = arith.addf %352, %356 : vector<8x1xf32>
    %358 = vector.extract_strided_slice %4 {offsets = [3, 9], sizes = [1, 1], strides = [1, 1]} : vector<10x10xf32> to vector<1x1xf32>
    %359 = vector.extract %358[0, 0] : f32 from vector<1x1xf32>
    %360 = vector.broadcast %359 : f32 to vector<8x1xf32>
    %361 = arith.mulf %91, %360 : vector<8x1xf32>
    %362 = arith.addf %357, %361 : vector<8x1xf32>
    %363 = vector.extract_strided_slice %4 {offsets = [4, 9], sizes = [1, 1], strides = [1, 1]} : vector<10x10xf32> to vector<1x1xf32>
    %364 = vector.extract %363[0, 0] : f32 from vector<1x1xf32>
    %365 = vector.broadcast %364 : f32 to vector<8x1xf32>
    %366 = arith.mulf %128, %365 : vector<8x1xf32>
    %367 = arith.addf %362, %366 : vector<8x1xf32>
    %368 = vector.extract_strided_slice %4 {offsets = [5, 9], sizes = [1, 1], strides = [1, 1]} : vector<10x10xf32> to vector<1x1xf32>
    %369 = vector.extract %368[0, 0] : f32 from vector<1x1xf32>
    %370 = vector.broadcast %369 : f32 to vector<8x1xf32>
    %371 = arith.mulf %170, %370 : vector<8x1xf32>
    %372 = arith.addf %367, %371 : vector<8x1xf32>
    %373 = vector.extract_strided_slice %4 {offsets = [6, 9], sizes = [1, 1], strides = [1, 1]} : vector<10x10xf32> to vector<1x1xf32>
    %374 = vector.extract %373[0, 0] : f32 from vector<1x1xf32>
    %375 = vector.broadcast %374 : f32 to vector<8x1xf32>
    %376 = arith.mulf %217, %375 : vector<8x1xf32>
    %377 = arith.addf %372, %376 : vector<8x1xf32>
    %378 = vector.extract_strided_slice %4 {offsets = [7, 9], sizes = [1, 1], strides = [1, 1]} : vector<10x10xf32> to vector<1x1xf32>
    %379 = vector.extract %378[0, 0] : f32 from vector<1x1xf32>
    %380 = vector.broadcast %379 : f32 to vector<8x1xf32>
    %381 = arith.mulf %269, %380 : vector<8x1xf32>
    %382 = arith.addf %377, %381 : vector<8x1xf32>
    %383 = vector.extract_strided_slice %4 {offsets = [8, 9], sizes = [1, 1], strides = [1, 1]} : vector<10x10xf32> to vector<1x1xf32>
    %384 = vector.extract %383[0, 0] : f32 from vector<1x1xf32>
    %385 = vector.broadcast %384 : f32 to vector<8x1xf32>
    %386 = arith.mulf %326, %385 : vector<8x1xf32>
    %387 = arith.addf %382, %386 : vector<8x1xf32>
    %388 = math.tanh %387 : vector<8x1xf32>
    %389 = vector.extract_strided_slice %4 {offsets = [9, 9], sizes = [1, 1], strides = [1, 1]} : vector<10x10xf32> to vector<1x1xf32>
    %390 = vector.extract %389[0, 0] : f32 from vector<1x1xf32>
    %391 = arith.mulf %388, %388 : vector<8x1xf32>
    %cst_26 = arith.constant 1.000000e+00 : f32
    %392 = vector.broadcast %cst_26 : f32 to vector<8x1xf32>
    %393 = arith.subf %392, %391 : vector<8x1xf32>
    %394 = vector.broadcast %390 : f32 to vector<8x1xf32>
    %395 = arith.mulf %393, %394 : vector<8x1xf32>
    %cst_27 = arith.constant 1.000000e+00 : f32
    %396 = vector.broadcast %cst_27 : f32 to vector<8x1xf32>
    %397 = arith.addf %396, %395 : vector<8x1xf32>
    %398 = math.absf %397 : vector<8x1xf32>
    %399 = math.log %398 : vector<8x1xf32>
    %400 = arith.addf %338, %399 : vector<8x1xf32>
    %401 = tpu.concatenate %10, %32, %59, %91, %128, %170, %217, %269, %326, %388 in 1 : vector<8x1xf32>, vector<8x1xf32>, vector<8x1xf32>, vector<8x1xf32>, vector<8x1xf32>, vector<8x1xf32>, vector<8x1xf32>, vector<8x1xf32>, vector<8x1xf32>, vector<8x1xf32> -> vector<8x10xf32>
    %cst_28 = arith.constant dense<0.000000e+00> : vector<8x10xf32>
    %402 = tpu.matmul %401, %2, %cst_28 {dimension_numbers = #tpu.dot_dimension_numbers<[1], [0], [0], [1], [0, 0, 1, 1], [], []>, precision = #tpu.contract_precision<fp32>} : vector<8x10xf32>, vector<10x10xf32>, vector<8x10xf32> -> vector<8x10xf32>
    %403 = arith.addf %0, %402 : vector<8x10xf32>
    %c0_29 = arith.constant 0 : index
    %c0_30 = arith.constant 0 : index
    %404 = vector.load %arg5[%c0_29, %c0_30] : memref<8x10xf32, #tpu.memory_space<vmem>>, vector<8x10xf32>
    tpu.vector_store %arg5[%c0_29, %c0_30], %403 {strides = array<i32>} : memref<8x10xf32, #tpu.memory_space<vmem>>, vector<8x10xf32>,
    %c0_31 = arith.constant 0 : index
    %c0_32 = arith.constant 0 : index
    %405 = vector.load %arg6[%c0_31, %c0_32] : memref<8x1xf32, #tpu.memory_space<vmem>>, vector<8x1xf32>
    tpu.vector_store %arg6[%c0_31, %c0_32], %400 {strides = array<i32>} : memref<8x1xf32, #tpu.memory_space<vmem>>, vector<8x1xf32>,
    return
  }
  func.func @transform_0(%arg0: i32) -> (i32, i32) {
    %c0_i32 = arith.constant 0 : i32
    %c0_i32_0 = arith.constant 0 : i32
    return %arg0, %c0_i32 : i32, i32
  }
  func.func @transform_1(%arg0: i32) -> (i32, i32) {
    %c0_i32 = arith.constant 0 : i32
    %c0_i32_0 = arith.constant 0 : i32
    %c0_i32_1 = arith.constant 0 : i32
    return %c0_i32, %c0_i32_0 : i32, i32
  }
  func.func @transform_2(%arg0: i32) -> (i32, i32) {
    %c0_i32 = arith.constant 0 : i32
    %c0_i32_0 = arith.constant 0 : i32
    %c0_i32_1 = arith.constant 0 : i32
    return %c0_i32, %c0_i32_0 : i32, i32
  }
  func.func @transform_3(%arg0: i32) -> i32 {
    %c0_i32 = arith.constant 0 : i32
    %c0_i32_0 = arith.constant 0 : i32
    return %c0_i32 : i32
  }
  func.func @transform_4(%arg0: i32) -> (i32, i32) {
    %c0_i32 = arith.constant 0 : i32
    %c0_i32_0 = arith.constant 0 : i32
    return %arg0, %c0_i32 : i32, i32
  }
  func.func @transform_5(%arg0: i32) -> (i32, i32) {
    %c0_i32 = arith.constant 0 : i32
    %c0_i32_0 = arith.constant 0 : i32
    return %arg0, %c0_i32 : i32, i32
  }
}

</mosaic_0001>

<bundles_post_ra>
// kernel: tpu_custom_call.1
= control target key start
LH: loop header
LB: loop body
LE: loop exit
PB: predicated region body
PF: predicated region fallthrough
CT: control target
= control target key end

     0   :  { %11 = vsyncpa [#allocation3], 0  ;;  %s3285_s0 = inlined_call_operand.hbm [shape: f32[8,10], index: 0, kind: input, shape index: {}]   ;;  %s3286_s1 = inlined_call_operand.hbm [shape: f32[10,10], index: 1, kind: input, shape index: {}]   ;;  %s3287_s2 = inlined_call_operand.hbm [shape: f32[10,10], index: 2, kind: input, shape index: {}]   ;;  %s3288_s3 = inlined_call_operand.vmem [shape: f32[10], index: 3, kind: input, shape index: {}]   ;;  %s3289_s4 = inlined_call_operand.hbm [shape: f32[8,10], index: 4, kind: output, shape index: {0}]   ;;  %s3290_s5 = inlined_call_operand.vmem [shape: f32[8,1], index: 5, kind: output, shape index: {1}]  }
   0x1   :  { %12 = vsyncpa [#allocation7], 0 }
   0x2   :  { %13 = vsyncpa [#allocation5], 0 }
   0x3   :  { %14 = vsyncpa [#allocation4], 0  ;;  %s2776_s18 = smov [#allocation6]   ;;  %s2668_s22 = scalar_lea.hbm %s3286_s1, 256 }
   0x4   :  { %s30_s19 = sshll.u32 %s2776_s18, 4  ;;  %p2669_p0 = scmp.ne.s32.totalorder %s3286_s1, %s2668_s22  ;;  %s31_s19 = int_to_ptr.vmem [resolvable:$true] %s30_s19 }
   0x5   :  { %p2672_p1 = scmp.lt.u32.totalorder %s2668_s22, %s3286_s1 }
   0x7   :  { %p2674_p2 = pnand %p2672_p1, %p2669_p0 }
   0x9   :  { %2677 = shalt.err (!%p2674_p2)
}
   0xa   :  { %s2678_s27 = scalar_lea.vmem %s31_s19, 256  ;;  %p2683_p4 = scmp.lt.s32.totalorder %s31_s19, %s31_s19 }
   0xb   :  { %p2679_p3 = scmp.ne.s32.totalorder %s31_s19, %s2678_s27  ;;  %p2684_p5 = scmp.lt.s32.totalorder %s2678_s27, %s2678_s27 }
   0xd   :  { %p2685_p6 = por %p2684_p5, %p2683_p4 }
   0xf   :  { %p2686_p7 = pnand %p2685_p6, %p2679_p3 }
  0x11   :  { %2689 = shalt.err (!%p2686_p7)
}
  0x12   :  { %s2777_s28 = smov 128   ;;  %s2778_s29 = smov 8  }
  0x13   :  { %36 = dma.hbm_to_vmem [thread:$0]  %s3286_s1, 256, %s31_s19, [#allocation7], %s2777_s28, %s2777_s28, %s2778_s29  }
  0x14   :  { %s2779_s7 = smov [#allocation2]   ;;  %s2780_s9 = smov [#allocation8]  }
  0x15   :  { %s21_s8 = sshll.u32 %s2779_s7, 4  ;;  %s42_s10 = sshll.u32 %s2780_s9, 4  ;;  %s22_s8 = int_to_ptr.vmem [resolvable:$true] %s21_s8  ;;  %s43_s10 = int_to_ptr.vmem [resolvable:$true] %s42_s10 }
  0x16   :  { %s2690_s13 = scalar_lea.hbm %s3285_s0, 128 }
  0x17   :  { %p2691_p8 = scmp.ne.s32.totalorder %s3285_s0, %s2690_s13  ;;  %p2694_p9 = scmp.lt.u32.totalorder %s2690_s13, %s3285_s0 }
  0x19   :  { %p2696_p10 = pnand %p2694_p9, %p2691_p8 }
  0x1b   :  { %2699 = shalt.err (!%p2696_p10)
}
  0x1c   :  { %s2700_s1 = scalar_lea.vmem %s22_s8, 128  ;;  %p2705_p12 = scmp.lt.s32.totalorder %s22_s8, %s22_s8 }
  0x1d   :  { %p2701_p11 = scmp.ne.s32.totalorder %s22_s8, %s2700_s1  ;;  %p2706_p13 = scmp.lt.s32.totalorder %s2700_s1, %s2700_s1 }
  0x1f   :  { %p2707_p0 = por %p2706_p13, %p2705_p12 }
  0x21   :  { %p2708_p1 = pnand %p2707_p0, %p2701_p11 }
  0x23   :  { %2711 = shalt.err (!%p2708_p1)
}
  0x24   :  { %24 = dma.hbm_to_vmem [thread:$0]  %s3285_s0, 128, %s22_s8, [#allocation3]  }
  0x25   :  { %s55_s22 = sshll.u32 %s3288_s3, 4  ;;  %s2712_s25 = scalar_lea.hbm %s3287_s2, 256  ;;  %s56_s22 = int_to_ptr.vmem [resolvable:$true] %s55_s22 }
  0x26   :  { %p2713_p2 = scmp.ne.s32.totalorder %s3287_s2, %s2712_s25  ;;  %p2716_p3 = scmp.lt.u32.totalorder %s2712_s25, %s3287_s2 }
  0x28   :  { %p2718_p4 = pnand %p2716_p3, %p2713_p2 }
  0x2a   :  { %2721 = shalt.err (!%p2718_p4)
}
  0x2b   :  { %s2722_s0 = scalar_lea.vmem %s43_s10, 256  ;;  %p2727_p6 = scmp.lt.s32.totalorder %s43_s10, %s43_s10 }
  0x2c   :  { %p2723_p5 = scmp.ne.s32.totalorder %s43_s10, %s2722_s0  ;;  %p2728_p7 = scmp.lt.s32.totalorder %s2722_s0, %s2722_s0 }
  0x2e   :  { %p2729_p8 = por %p2728_p7, %p2727_p6 }
  0x30   :  { %p2730_p9 = pnand %p2729_p8, %p2723_p5 }
  0x32   :  { %2733 = shalt.err (!%p2730_p9)
}
  0x33   :  { %48 = dma.hbm_to_vmem [thread:$0]  %s3287_s2, 256, %s43_s10, [#allocation7], %s2777_s28, %s2777_s28, %s2778_s29  }
  0x34   :  { %s2734_s8 = scalar_lea.vmem %s56_s22, 16  ;;  %p2739_p11 = scmp.lt.s32.totalorder %s56_s22, %s56_s22 }
  0x35   :  { %p2735_p10 = scmp.ne.s32.totalorder %s56_s22, %s2734_s8  ;;  %p2740_p12 = scmp.lt.s32.totalorder %s2734_s8, %s2734_s8 }
  0x37   :  { %p2741_p13 = por %p2740_p12, %p2739_p11 }
  0x39   :  { %p2742_p0 = pnand %p2741_p13, %p2735_p10 }
  0x3b   :  { %2745 = shalt.err (!%p2742_p0)
}
  0x3c   :  { %s2781_s9 = smov [#allocation9]  }
  0x3d   :  { %58 = dma.vmem_to_smem %s56_s22, 16, %s2781_s9, [#allocation5]  }
  0x3e   :  { %2768 = dma.done.wait [#allocation3], 128  }
  0x3f   :  { %2769 = vsyncadd [#allocation3], 4294967168 }
  0x40   :  { %2770 = dma.done.wait [#allocation7], 512  }
  0x41   :  { %2771 = vsyncadd [#allocation7], 4294966784 }
  0x42   :  { %2772 = dma.done.wait [#allocation5], 16  }
  0x43   :  { %2773 = vsyncadd [#allocation5], 4294967280 }
  0x44   :  { %71 = sfence }
  0x45   :  { %v73_v0 = vld [vmem:[#allocation6] sm:$0xff]  ;;  %v74_v1 = vld [vmem:[#allocation6 + $0x8] sm:$0x3]  ;;  %vm77_vm0 = vcmask 80896   ;;  %v75_v2 = vld [vmem:[#allocation8] sm:$0xff]  ;;  %v2782_v16 = vmov 0.0|0.0  }
  0x46   :  { %v82_v3 = vsel %vm77_vm0, %v73_v0, 0  ;;  %v85_v4 = vsel %vm77_vm0, %v74_v1, 0  ;;  %v547_v5 = vsel %vm77_vm0, %v75_v2, 0  ;;  %v76_v6 = vld [vmem:[#allocation8 + $0x8] sm:$0x3]  ;;  %2408 = vmatprep.subr.bf16.mxu0 %v2782_v16  ;;  %vm2783_vm1 = vmmov 0  }
  0x47   :  { %v88_v7 = vand.u32 4294901760, %v82_v3  ;;  %v91_v8 = vand.u32 4294901760, %v85_v4  ;;  %v2881_v9 = vand.u32 4294901760, %v547_v5  ;;  %v550_v10 = vsel %vm77_vm0, %v76_v6, 0  ;;  %v72_v12 = vld [vmem:[#allocation2] sm:$0xff]  ;;  %s2785_s2 = smov 126  }
  0x48   :  { %v2884_v11 = vand.u32 4294901760, %v550_v10  ;;  %v79_v21 = vsel %vm77_vm0, %v72_v12, 0  ;;  %v2784_v24 = vmov 0.0   ;;  %s2786_s28 = smov 127   ;;  %s2787_s10 = smov 125   ;;  %vm1727_vm2 = vcmask 1041408  }
  0x49   :  { %v2886_v13 = vpack.c.bf16 %v91_v8, %v88_v7  ;;  %v620_v14 = vsub.f32 %v547_v5, %v2881_v9  ;;  %v166_v15 = vsub.f32 %v82_v3, %v88_v7  ;;  %v173_v18 = vsub.f32 %v85_v4, %v91_v8  ;;  %2286 = vmatprep.mubr.msk.f32.mxu0 %vm2783_vm1, %v2784_v24  ;;  %s1054_s11 = sld [smem:[#allocation9]]  ;;  %s2788_s15 = smov 1  }
  0x4a   :  { %v630_v17 = vsub.f32 %v550_v10, %v2884_v11  ;;  %v154_v25 = vand.u32 4294901760, %v79_v21  ;;  %s2789_s17 = smov 2   ;;  %s2790_s1 = smov 124   ;;  %vm1706_vm3 = vcmask 7168   ;;  %vm1708_vm4 = vcmask 15360  }
  0x4b   :  { %2427 = vmatprep.subr.bf16.mxu1 %v2886_v13  ;;  %v621_v19 = vand.u32 4294901760, %v620_v14  ;;  %v167_v20 = vand.u32 4294901760, %v166_v15  ;;  %2410 = vmatpush3.bf16.xpose.msra.mxu0 %v2886_v13  ;;  %v174_v23 = vand.u32 4294901760, %v173_v18  ;;  %v2415_v37 = vpack.c.bf16 %v173_v18, %v166_v15  ;;  %s2213_s18 = sld [smem:[#allocation9 + $0x1]]  ;;  %s2791_s23 = smov 3  }
  0x4c   :  { %2429 = vmatpush3.bf16.xpose.msra.mxu1 %v2886_v13  ;;  %v631_v22 = vand.u32 4294901760, %v630_v17  ;;  %2411 = vmatprep.subr.bf16.mxu0 %v2782_v16  ;;  %v155_v30 = vsub.f32 %v79_v21, %v154_v25  ;;  %s2792_s24 = smov 123   ;;  %s2214_s25 = sld [smem:[#allocation9 + $0x2]]  ;;  %vm1710_vm5 = vcmask 23552   ;;  %vm1712_vm6 = vcmask 31744  }
  0x4d   :  { %v622_v26 = vsub.f32 %v620_v14, %v621_v19  ;;  %v168_v27 = vsub.f32 %v166_v15, %v167_v20  ;;  %v175_v29 = vsub.f32 %v173_v18, %v174_v23  ;;  %v2421_v40 = vpack.c.bf16 %v174_v23, %v167_v20  ;;  %s2215_s27 = sld [smem:[#allocation9 + $0x3]]  ;;  %s2793_s3 = smov 4  }
  0x4e   :  { %v632_v28 = vsub.f32 %v630_v17, %v631_v22  ;;  %v156_v35 = vand.u32 4294901760, %v155_v30  ;;  %s2794_s8 = smov 122   ;;  %vm1714_vm7 = vcmask 39936   ;;  %vm1716_vm8 = vcmask 48128  }
  0x4f   :  { %v623_v31 = vand.u32 4294901760, %v622_v26  ;;  %v169_v32 = vand.u32 4294901760, %v168_v27  ;;  %v176_v34 = vand.u32 4294901760, %v175_v29  ;;  %v1055_v52 = vstv %s1054_s11  ;;  %s2216_s11 = sld [smem:[#allocation9 + $0x4]] }
  0x50   :  { %v633_v33 = vand.u32 4294901760, %v632_v28  ;;  %v157_v38 = vsub.f32 %v155_v30, %v156_v35  ;;  %vm1718_vm9 = vcmask 56320   ;;  %vm1720_vm10 = vcmask 64512  }
  0x51   :  { %2328 = vmatprep.mubr.f32.mxu1 %v623_v31  ;;  %v2412_v36 = vpack.c.bf16 %v176_v34, %v169_v32  ;;  %v1069_v60 = vstv %s2213_s18  ;;  %vm1722_vm11 = vcmask 72704  }
  0x52   :  { %v158_v39 = vand.u32 4294901760, %v157_v38 }
  0x53   :  { %2329 = vmatmul.mubr.f32.vlgmr.msra.gmra.mrb[0].mxu1 %v633_v33  ;;  %2431 = vmatprep.subr.bf16.mxu1 %v2412_v36  ;;  %v1141_v27 = vstv %s2215_s27  ;;  %s2217_s27 = sld [smem:[#allocation9 + $0x5]] }
  0x54   :  { %2335 = vmatprep.mubr.f32.mxu1 %v2881_v9  ;;  %2433 = vmatpush3.bf16.xpose.msra.mxu1 %v2412_v36 }
  0x55   :  { %2435 = vmatprep.subr.bf16.mxu1 %v2415_v37  ;;  %2287 = vmatmul.mubr.f32.vlgmr.msra.gmra.mrb[0].mxu0 %v158_v39 }
  0x56   :  { %2413 = vmatpush3.bf16.xpose.msra.mxu0 %v2412_v36  ;;  %2293 = vmatprep.mubr.msk.f32.mxu0 %vm2783_vm1, %v2784_v24 }
  0x57   :  { %2414 = vmatprep.subr.bf16.mxu0 %v2782_v16 }
  0x5b   :  { %2336 = vmatmul.mubr.f32.vlgmr.msra.gmra.mrb[0].mxu1 %v2884_v11 }
  0x5c   :  { %2437 = vmatpush3.bf16.xpose.msra.mxu1 %v2415_v37  ;;  %2342 = vmatprep.mubr.f32.mxu1 %v620_v14 }
  0x5d   :  { %2439 = vmatprep.subr.bf16.mxu1 %v2886_v13  ;;  %2294 = vmatmul.mubr.f32.vlgmr.msra.gmra.mrb[0].mxu0 %v154_v25 }
  0x5e   :  { %2416 = vmatpush3.bf16.xpose.msra.mxu0 %v2415_v37  ;;  %2300 = vmatprep.mubr.msk.f32.mxu0 %vm2783_vm1, %v2784_v24 }
  0x5f   :  { %2417 = vmatprep.subr.bf16.mxu0 %v2782_v16 }
  0x63   :  { %2343 = vmatmul.mubr.f32.vlgmr.msra.gmra.mrb[0].mxu1 %v630_v17 }
  0x64   :  { %2441 = vmatpush3.bf16.xpose.msra.mxu1 %v2886_v13  ;;  %2349 = vmatprep.mubr.f32.mxu1 %v621_v19 }
  0x65   :  { %2443 = vmatprep.subr.bf16.mxu1 %v2421_v40  ;;  %2301 = vmatmul.mubr.f32.vlgmr.msra.gmra.mrb[0].mxu0 %v155_v30 }
  0x66   :  { %2419 = vmatpush3.bf16.xpose.msra.mxu0 %v2886_v13  ;;  %2307 = vmatprep.mubr.msk.f32.mxu0 %vm2783_vm1, %v2784_v24 }
  0x67   :  { %2420 = vmatprep.subr.bf16.mxu0 %v2782_v16 }
  0x6b   :  { %2350 = vmatmul.mubr.f32.vlgmr.msra.gmra.mrb[0].mxu1 %v631_v22 }
  0x6c   :  { %2445 = vmatpush3.bf16.xpose.msra.mxu1 %v2421_v40  ;;  %2356 = vmatprep.mubr.f32.mxu1 %v2881_v9 }
  0x6d   :  { %2447 = vmatprep.subr.bf16.mxu1 %v2886_v13  ;;  %2308 = vmatmul.mubr.f32.vlgmr.msra.gmra.mrb[0].mxu0 %v156_v35 }
  0x6e   :  { %2422 = vmatpush3.bf16.xpose.msra.mxu0 %v2421_v40  ;;  %2314 = vmatprep.mubr.msk.f32.mxu0 %vm2783_vm1, %v2784_v24 }
  0x6f   :  { %2423 = vmatprep.subr.bf16.mxu0 %v2782_v16 }
  0x73   :  { %2357 = vmatmul.mubr.f32.vlgmr.msra.gmra.mrb[0].mxu1 %v2884_v11 }
  0x74   :  { %2449 = vmatpush3.bf16.xpose.msra.mxu1 %v2886_v13  ;;  %2363 = vmatprep.mubr.f32.mxu1 %v2881_v9 }
  0x75   :  { %2315 = vmatmul.mubr.f32.vlgmr.msra.gmra.mrb[0].mxu0 %v154_v25  ;;  %2453 = vmatprep.subr.bf16.mxu1 %v2782_v16 }
  0x76   :  { %2425 = vmatpush3.bf16.xpose.msra.mxu0 %v2886_v13  ;;  %2321 = vmatprep.mubr.msk.f32.mxu0 %vm2783_vm1, %v2784_v24  ;;  %v1100_v13 = vstv %s2214_s25  ;;  %s2796_s25 = smov 121  }
  0x77   :  { %2450 = vmatprep.subr.bf16.mxu0 %v2782_v16 }
  0x7b   :  { %2364 = vmatmul.mubr.f32.vlgmr.msra.gmra.mrb[0].mxu1 %v2884_v11 }
  0x7c   :  { %2377 = vmatprep.mubr.msk.f32.mxu1 %vm2783_vm1, %v2784_v24 }
  0x7d   :  { %2322 = vmatmul.mubr.f32.vlgmr.msra.gmra.mrb[0].mxu0 %v154_v25 }
  0x7e   :  { %2370 = vmatprep.mubr.msk.f32.mxu0 %vm2783_vm1, %v2784_v24 }
 0x14e   :  { %v2930_v41 = vpop.f32.mrb[0].mxu1 }
 0x14f   :  { %v2932_v42 = vpop.f32.mrb[1].mxu1 }
 0x150   :  { %1102 = vrot.lane.b32.xlu1 %v2932_v42, %s2785_s2  ;;  %1071 = vrot.lane.b32.xlu0 %v2932_v42, %s2786_s28  ;;  %2488 = vpush %v2932_v42  ;;  %v2939_v43 = vpop.f32.mrb[0].mxu0  ;;  %v2942_v45 = vrot.slane %v2932_v42, 1  ;;  %v2949_v46 = vrot.slane %v2932_v42, 2  ;;  %v2969_v59 = vrot.slane %v2932_v42, 3  ;;  %v2995_v12 = vrot.slane %v2932_v42, 4 }
 0x151   :  { %v2323_v44 = vpop.f32.mrb[1].mxu0  ;;  %v1056_v53 = vadd.f32 %v1055_v52, %v2939_v43  ;;  %v1070_v61 = vadd.f32 %v1069_v60, %v2939_v43  ;;  %v1101_v14 = vadd.f32 %v1100_v13, %v2939_v43  ;;  %v1142_v28 = vadd.f32 %v1141_v27, %v2939_v43 }
 0x152   :  { %v3024_v40 = vrot.slane %v2932_v42, 5  ;;  %v3056_v13 = vrot.slane %v2932_v42, 6 }
 0x153   :  { %2625 = vtanh.f32 %v1056_v53 }
 0x154   :  { %1112 = vrot.lane.b32.xlu1 %v2942_v45, %s2785_s2  ;;  %1083 = vrot.lane.b32.xlu0 %v2942_v45, %s2786_s28 }
 0x158   :  { %1124 = vrot.lane.b32.xlu1 %v2949_v46, %s2785_s2 }
 0x15c   :  { %1153 = vrot.lane.b32.xlu1 %v2942_v45, %s2787_s10 }
 0x15d   :  { %v2958_v54 = vpop.eup %2625 }
 0x181   :  { %s2956_s12 = spop %2488 }
 0x1c2   :  { %v1103_v47 = vpop.permute.xlu1 %1102  ;;  %v1072_v48 = vpop.permute.xlu0 %1071 }
 0x1c3   :  { %2490 = vpush %v1072_v48 }
 0x1c6   :  { %v1113_v49 = vpop.permute.xlu1 %1112  ;;  %v1084_v50 = vpop.permute.xlu0 %1083 }
 0x1c7   :  { %2492 = vpush %v1084_v50 }
 0x1c8   :  { %2494 = vpush %v1103_v47 }
 0x1c9   :  { %2496 = vpush %v1113_v49 }
 0x1ca   :  { %v1125_v51 = vpop.permute.xlu1 %1124 }
 0x1cb   :  { %2498 = vpush %v1125_v51 }
 0x1ce   :  { %v1154_v63 = vpop.permute.xlu1 %1153 }
 0x1f4   :  { %s2491_s13 = spop %2490 }
 0x1f5   :  { %v1074_v55 = vstv %s2491_s13 }
 0x1f6   :  { %v1075_v56 = vmul.f32 %v2958_v54, %v1074_v55 }
 0x1f8   :  { %s2961_s14 = spop %2492  ;;  %1077 = vrot.lane.b32.xlu0 %v1075_v56, %s2788_s15 }
 0x1f9   :  { %s2495_s16 = spop %2494 }
 0x1fa   :  { %v1105_v57 = vstv %s2495_s16  ;;  %s2497_s19 = spop %2496 }
 0x1fb   :  { %v1106_v58 = vmul.f32 %v2958_v54, %v1105_v57  ;;  %v1115_v6 = vstv %s2497_s19  ;;  %v1192_v57 = vstv %s2216_s11  ;;  %s2795_s19 = smov 5  }
 0x1fc   :  { %1143 = vrot.lane.b32.xlu0 %v2932_v42, %s2787_s10  ;;  %s2988_s20 = spop %2498 }
 0x1fd   :  { %1108 = vrot.lane.b32.xlu1 %v1106_v58, %s2789_s17  ;;  %v1193_v58 = vadd.f32 %v1192_v57, %v2939_v43  ;;  %v3092_v57 = vrot.slane %v2932_v42, 7 }
 0x200   :  { %1163 = vrot.lane.b32.xlu0 %v2949_v46, %s2787_s10 }
 0x201   :  { %1175 = vrot.lane.b32.xlu1 %v2969_v59, %s2787_s10 }
 0x205   :  { %1204 = vrot.lane.b32.xlu1 %v2942_v45, %s2790_s1 }
 0x209   :  { %1224 = vrot.lane.b32.xlu1 %v2969_v59, %s2790_s1 }
 0x26a   :  { %v1078_v62 = vpop.permute.xlu0 %1077 }
 0x26b   :  { %v1080_v0 = vadd.f32 %v1078_v62, %v1070_v61 }
 0x26d   :  { %2627 = vtanh.f32 %v1080_v0 }
 0x26e   :  { %v1144_v1 = vpop.permute.xlu0 %1143 }
 0x26f   :  { %v1109_v2 = vpop.permute.xlu1 %1108  ;;  %2500 = vpush %v1144_v1 }
 0x270   :  { %2502 = vpush %v1154_v63  ;;  %v1111_v15 = vadd.f32 %v1109_v2, %v1101_v14 }
 0x272   :  { %v1164_v3 = vpop.permute.xlu0 %1163 }
 0x273   :  { %v1176_v4 = vpop.permute.xlu1 %1175  ;;  %2504 = vpush %v1164_v3 }
 0x274   :  { %2506 = vpush %v1176_v4 }
 0x277   :  { %v2980_v5 = vpop.eup %2627  ;;  %v1205_v19 = vpop.permute.xlu1 %1204 }
 0x278   :  { %v1116_v7 = vmul.f32 %v2980_v5, %v1115_v6 }
 0x27a   :  { %1118 = vrot.lane.b32.xlu0 %v1116_v7, %s2788_s15 }
 0x27b   :  { %v1225_v22 = vpop.permute.xlu1 %1224 }
 0x27e   :  { %1194 = vrot.lane.b32.xlu0 %v2932_v42, %s2790_s1 }
 0x282   :  { %1214 = vrot.lane.b32.xlu0 %v2949_v46, %s2790_s1 }
 0x2a0   :  { %s2501_s21 = spop %2500 }
 0x2a1   :  { %v1146_v8 = vstv %s2501_s21  ;;  %s2503_s22 = spop %2502 }
 0x2a2   :  { %v1147_v9 = vmul.f32 %v2958_v54, %v1146_v8  ;;  %v1156_v10 = vstv %s2503_s22 }
 0x2a3   :  { %v1157_v11 = vmul.f32 %v2980_v5, %v1156_v10 }
 0x2a4   :  { %1149 = vrot.lane.b32.xlu0 %v1147_v9, %s2791_s23  ;;  %s2505_s26 = spop %2504 }
 0x2a5   :  { %1159 = vrot.lane.b32.xlu1 %v1157_v11, %s2789_s17  ;;  %v1166_v25 = vstv %s2505_s26  ;;  %s3015_s30 = spop %2506 }
 0x2a9   :  { %1236 = vrot.lane.b32.xlu1 %v2995_v12, %s2790_s1 }
 0x2ad   :  { %1265 = vrot.lane.b32.xlu1 %v2942_v45, %s2792_s24 }
 0x2b1   :  { %1285 = vrot.lane.b32.xlu1 %v2969_v59, %s2792_s24 }
 0x2ec   :  { %v1119_v17 = vpop.permute.xlu0 %1118 }
 0x2ed   :  { %v1121_v18 = vadd.f32 %v1119_v17, %v1111_v15 }
 0x2ef   :  { %2629 = vtanh.f32 %v1121_v18 }
 0x2f0   :  { %v1195_v20 = vpop.permute.xlu0 %1194 }
 0x2f1   :  { %2508 = vpush %v1195_v20 }
 0x2f2   :  { %2510 = vpush %v1205_v19 }
 0x2f4   :  { %v1215_v21 = vpop.permute.xlu0 %1214 }
 0x2f5   :  { %2512 = vpush %v1215_v21 }
 0x2f6   :  { %2514 = vpush %v1225_v22 }
 0x2f9   :  { %v3004_v23 = vpop.eup %2629 }
 0x2fa   :  { %v1167_v26 = vmul.f32 %v3004_v23, %v1166_v25 }
 0x2fc   :  { %1169 = vrot.lane.b32.xlu0 %v1167_v26, %s2788_s15 }
 0x300   :  { %1255 = vrot.lane.b32.xlu0 %v2932_v42, %s2792_s24 }
 0x304   :  { %1275 = vrot.lane.b32.xlu0 %v2949_v46, %s2792_s24 }
 0x308   :  { %1295 = vrot.lane.b32.xlu0 %v2995_v12, %s2792_s24 }
 0x316   :  { %v1150_v29 = vpop.permute.xlu0 %1149 }
 0x317   :  { %v1160_v30 = vpop.permute.xlu1 %1159  ;;  %v1152_v31 = vadd.f32 %v1150_v29, %v1142_v28  ;;  %v1253_v28 = vstv %s2217_s27 }
 0x318   :  { %v1254_v29 = vadd.f32 %v1253_v28, %v2939_v43 }
 0x319   :  { %v1162_v32 = vadd.f32 %v1160_v30, %v1152_v31 }
 0x31b   :  { %v1237_v33 = vpop.permute.xlu1 %1236 }
 0x31c   :  { %2516 = vpush %v1237_v33 }
 0x31f   :  { %v1266_v48 = vpop.permute.xlu1 %1265 }
 0x322   :  { %s2509_s6 = spop %2508 }
 0x323   :  { %v1197_v34 = vstv %s2509_s6  ;;  %s2511_s0 = spop %2510  ;;  %v1286_v51 = vpop.permute.xlu1 %1285 }
 0x324   :  { %v1198_v35 = vmul.f32 %v2958_v54, %v1197_v34  ;;  %v1207_v36 = vstv %s2511_s0 }
 0x325   :  { %v1208_v37 = vmul.f32 %v2980_v5, %v1207_v36 }
 0x326   :  { %1200 = vrot.lane.b32.xlu1 %v1198_v35, %s2793_s3  ;;  %s2513_s7 = spop %2512 }
 0x327   :  { %1210 = vrot.lane.b32.xlu0 %v1208_v37, %s2791_s23  ;;  %v1217_v38 = vstv %s2513_s7  ;;  %s2515_s9 = spop %2514 }
 0x328   :  { %v1218_v39 = vmul.f32 %v3004_v23, %v1217_v38  ;;  %v1227_v55 = vstv %s2515_s9  ;;  %s2797_s9 = smov 6  }
 0x32a   :  { %1220 = vrot.lane.b32.xlu1 %v1218_v39, %s2789_s17 }
 0x32e   :  { %1307 = vrot.lane.b32.xlu1 %v3024_v40, %s2792_s24 }
 0x332   :  { %1336 = vrot.lane.b32.xlu1 %v2942_v45, %s2794_s8 }
 0x336   :  { %1356 = vrot.lane.b32.xlu1 %v2969_v59, %s2794_s8 }
 0x33a   :  { %1376 = vrot.lane.b32.xlu1 %v3024_v40, %s2794_s8 }
 0x34d   :  { %s3045_s13 = spop %2516 }
 0x36e   :  { %v1170_v44 = vpop.permute.xlu0 %1169 }
 0x36f   :  { %v1172_v47 = vadd.f32 %v1170_v44, %v1162_v32 }
 0x371   :  { %2631 = vtanh.f32 %v1172_v47 }
 0x372   :  { %v1256_v49 = vpop.permute.xlu0 %1255 }
 0x373   :  { %2518 = vpush %v1256_v49 }
 0x374   :  { %2520 = vpush %v1266_v48 }
 0x376   :  { %v1276_v50 = vpop.permute.xlu0 %1275 }
 0x377   :  { %2522 = vpush %v1276_v50 }
 0x378   :  { %2524 = vpush %v1286_v51 }
 0x37a   :  { %v1296_v52 = vpop.permute.xlu0 %1295 }
 0x37b   :  { %v3034_v53 = vpop.eup %2631  ;;  %2526 = vpush %v1296_v52 }
 0x37c   :  { %v1228_v56 = vmul.f32 %v3034_v53, %v1227_v55 }
 0x37e   :  { %1230 = vrot.lane.b32.xlu0 %v1228_v56, %s2788_s15 }
 0x382   :  { %1326 = vrot.lane.b32.xlu0 %v2932_v42, %s2794_s8 }
 0x386   :  { %1346 = vrot.lane.b32.xlu0 %v2949_v46, %s2794_s8 }
 0x38a   :  { %1366 = vrot.lane.b32.xlu0 %v2995_v12, %s2794_s8 }
 0x398   :  { %v1201_v60 = vpop.permute.xlu1 %1200 }
 0x399   :  { %v1203_v61 = vadd.f32 %v1201_v60, %v1193_v58  ;;  %v1211_v62 = vpop.permute.xlu0 %1210 }
 0x39b   :  { %v1213_v63 = vadd.f32 %v1211_v62, %v1203_v61 }
 0x39c   :  { %v1221_v0 = vpop.permute.xlu1 %1220 }
 0x39d   :  { %v1223_v1 = vadd.f32 %v1221_v0, %v1213_v63 }
 0x3a0   :  { %v1308_v2 = vpop.permute.xlu1 %1307 }
 0x3a1   :  { %2528 = vpush %v1308_v2 }
 0x3a4   :  { %s2519_s16 = spop %2518  ;;  %v1337_v15 = vpop.permute.xlu1 %1336 }
 0x3a5   :  { %v1258_v3 = vstv %s2519_s16  ;;  %s2521_s18 = spop %2520 }
 0x3a6   :  { %v1259_v4 = vmul.f32 %v2958_v54, %v1258_v3  ;;  %v1268_v6 = vstv %s2521_s18 }
 0x3a7   :  { %v1269_v7 = vmul.f32 %v2980_v5, %v1268_v6 }
 0x3a8   :  { %1261 = vrot.lane.b32.xlu0 %v1259_v4, %s2795_s19  ;;  %s2523_s21 = spop %2522  ;;  %v1357_v19 = vpop.permute.xlu1 %1356 }
 0x3a9   :  { %1271 = vrot.lane.b32.xlu1 %v1269_v7, %s2793_s3  ;;  %v1278_v8 = vstv %s2523_s21  ;;  %s2525_s22 = spop %2524  ;;  %s3291_s21 = smov 120  }
 0x3aa   :  { %v1279_v9 = vmul.f32 %v3004_v23, %v1278_v8  ;;  %v1288_v10 = vstv %s2525_s22 }
 0x3ab   :  { %v1289_v11 = vmul.f32 %v3034_v53, %v1288_v10 }
 0x3ac   :  { %1281 = vrot.lane.b32.xlu0 %v1279_v9, %s2791_s23  ;;  %s2527_s26 = spop %2526  ;;  %v1377_v25 = vpop.permute.xlu1 %1376 }
 0x3ad   :  { %1291 = vrot.lane.b32.xlu1 %v1289_v11, %s2789_s17  ;;  %v1298_v26 = vstv %s2527_s26  ;;  %s2218_s26 = sld [smem:[#allocation9 + $0x6]] }
 0x3b1   :  { %1388 = vrot.lane.b32.xlu1 %v3056_v13, %s2794_s8 }
 0x3b3   :  { %v1324_v8 = vstv %s2218_s26 }
 0x3b4   :  { %v1325_v9 = vadd.f32 %v1324_v8, %v2939_v43 }
 0x3b5   :  { %1417 = vrot.lane.b32.xlu1 %v2942_v45, %s2796_s25 }
 0x3b9   :  { %1437 = vrot.lane.b32.xlu1 %v2969_v59, %s2796_s25 }
 0x3bd   :  { %1457 = vrot.lane.b32.xlu1 %v3024_v40, %s2796_s25 }
 0x3d2   :  { %s3079_s6 = spop %2528 }
 0x3f0   :  { %v1231_v14 = vpop.permute.xlu0 %1230 }
 0x3f1   :  { %v1233_v17 = vadd.f32 %v1231_v14, %v1223_v1 }
 0x3f3   :  { %2633 = vtanh.f32 %v1233_v17 }
 0x3f4   :  { %v1327_v18 = vpop.permute.xlu0 %1326 }
 0x3f5   :  { %2530 = vpush %v1327_v18 }
 0x3f6   :  { %2532 = vpush %v1337_v15 }
 0x3f8   :  { %v1347_v20 = vpop.permute.xlu0 %1346 }
 0x3f9   :  { %2534 = vpush %v1347_v20 }
 0x3fa   :  { %2536 = vpush %v1357_v19 }
 0x3fc   :  { %v1367_v21 = vpop.permute.xlu0 %1366 }
 0x3fd   :  { %v3066_v22 = vpop.eup %2633  ;;  %2538 = vpush %v1367_v21 }
 0x3fe   :  { %2540 = vpush %v1377_v25  ;;  %v1299_v27 = vmul.f32 %v3066_v22, %v1298_v26 }
 0x400   :  { %1301 = vrot.lane.b32.xlu0 %v1299_v27, %s2788_s15 }
 0x404   :  { %1407 = vrot.lane.b32.xlu0 %v2932_v42, %s2796_s25 }
 0x408   :  { %1427 = vrot.lane.b32.xlu0 %v2949_v46, %s2796_s25 }
 0x40c   :  { %1447 = vrot.lane.b32.xlu0 %v2995_v12, %s2796_s25 }
 0x410   :  { %1467 = vrot.lane.b32.xlu0 %v3056_v13, %s2796_s25 }
 0x41a   :  { %v1262_v30 = vpop.permute.xlu0 %1261 }
 0x41b   :  { %v1272_v31 = vpop.permute.xlu1 %1271  ;;  %v1264_v32 = vadd.f32 %v1262_v30, %v1254_v29 }
 0x41d   :  { %v1274_v33 = vadd.f32 %v1272_v31, %v1264_v32 }
 0x41e   :  { %v1282_v34 = vpop.permute.xlu0 %1281 }
 0x41f   :  { %v1292_v35 = vpop.permute.xlu1 %1291  ;;  %v1284_v36 = vadd.f32 %v1282_v34, %v1274_v33 }
 0x421   :  { %v1294_v37 = vadd.f32 %v1292_v35, %v1284_v36 }
 0x423   :  { %v1389_v38 = vpop.permute.xlu1 %1388 }
 0x424   :  { %2542 = vpush %v1389_v38 }
 0x426   :  { %s2531_s0 = spop %2530 }
 0x427   :  { %v1329_v39 = vstv %s2531_s0  ;;  %s2533_s7 = spop %2532  ;;  %v1418_v60 = vpop.permute.xlu1 %1417 }
 0x428   :  { %v1330_v44 = vmul.f32 %v2958_v54, %v1329_v39  ;;  %v1339_v47 = vstv %s2533_s7 }
 0x429   :  { %v1340_v48 = vmul.f32 %v2980_v5, %v1339_v47 }
 0x42a   :  { %1332 = vrot.lane.b32.xlu1 %v1330_v44, %s2797_s9  ;;  %s2535_s11 = spop %2534 }
 0x42b   :  { %1342 = vrot.lane.b32.xlu0 %v1340_v48, %s2795_s19  ;;  %v1349_v49 = vstv %s2535_s11  ;;  %s2537_s16 = spop %2536  ;;  %v1438_v63 = vpop.permute.xlu1 %1437  ;;  %s2799_s11 = smov 7  }
 0x42c   :  { %v1350_v50 = vmul.f32 %v3004_v23, %v1349_v49  ;;  %v1359_v51 = vstv %s2537_s16 }
 0x42d   :  { %v1360_v52 = vmul.f32 %v3034_v53, %v1359_v51 }
 0x42e   :  { %1352 = vrot.lane.b32.xlu1 %v1350_v50, %s2793_s3  ;;  %s2539_s18 = spop %2538 }
 0x42f   :  { %1362 = vrot.lane.b32.xlu0 %v1360_v52, %s2791_s23  ;;  %v1369_v55 = vstv %s2539_s18  ;;  %s2541_s22 = spop %2540  ;;  %v1458_v3 = vpop.permute.xlu1 %1457 }
 0x430   :  { %v1370_v56 = vmul.f32 %v3066_v22, %v1369_v55  ;;  %v1379_v4 = vstv %s2541_s22 }
 0x432   :  { %1372 = vrot.lane.b32.xlu1 %v1370_v56, %s2789_s17 }
 0x436   :  { %1479 = vrot.lane.b32.xlu1 %v3092_v57, %s2796_s25 }
 0x43a   :  { %1508 = vrot.lane.b32.xlu1 %v2942_v45, %s3291_s21 }
 0x43e   :  { %1528 = vrot.lane.b32.xlu1 %v2969_v59, %s3291_s21 }
 0x442   :  { %1548 = vrot.lane.b32.xlu1 %v3024_v40, %s3291_s21 }
 0x446   :  { %1568 = vrot.lane.b32.xlu1 %v3092_v57, %s3291_s21 }
 0x455   :  { %s3117_s27 = spop %2542 }
 0x472   :  { %v1302_v58 = vpop.permute.xlu0 %1301 }
 0x473   :  { %v1304_v61 = vadd.f32 %v1302_v58, %v1294_v37 }
 0x475   :  { %2635 = vtanh.f32 %v1304_v61 }
 0x476   :  { %v1408_v62 = vpop.permute.xlu0 %1407 }
 0x477   :  { %2544 = vpush %v1408_v62 }
 0x478   :  { %2546 = vpush %v1418_v60 }
 0x47a   :  { %v1428_v0 = vpop.permute.xlu0 %1427 }
 0x47b   :  { %2548 = vpush %v1428_v0 }
 0x47c   :  { %2550 = vpush %v1438_v63 }
 0x47e   :  { %v1448_v1 = vpop.permute.xlu0 %1447 }
 0x47f   :  { %v3104_v2 = vpop.eup %2635  ;;  %2552 = vpush %v1448_v1 }
 0x480   :  { %2554 = vpush %v1458_v3  ;;  %v1380_v6 = vmul.f32 %v3104_v2, %v1379_v4 }
 0x482   :  { %1382 = vrot.lane.b32.xlu0 %v1380_v6, %s2788_s15  ;;  %v1468_v7 = vpop.permute.xlu0 %1467 }
 0x483   :  { %2556 = vpush %v1468_v7 }
 0x486   :  { %1498 = vrot.lane.b32.xlu0 %v2932_v42, %s3291_s21 }
 0x48a   :  { %1518 = vrot.lane.b32.xlu0 %v2949_v46, %s3291_s21 }
 0x48e   :  { %1538 = vrot.lane.b32.xlu0 %v2995_v12, %s3291_s21 }
 0x492   :  { %1558 = vrot.lane.b32.xlu0 %v3056_v13, %s3291_s21 }
 0x49c   :  { %v1333_v10 = vpop.permute.xlu1 %1332 }
 0x49d   :  { %v1335_v11 = vadd.f32 %v1333_v10, %v1325_v9  ;;  %v1343_v14 = vpop.permute.xlu0 %1342 }
 0x49f   :  { %v1345_v15 = vadd.f32 %v1343_v14, %v1335_v11 }
 0x4a0   :  { %v1353_v17 = vpop.permute.xlu1 %1352 }
 0x4a1   :  { %v1355_v18 = vadd.f32 %v1353_v17, %v1345_v15  ;;  %v1363_v19 = vpop.permute.xlu0 %1362 }
 0x4a3   :  { %v1365_v20 = vadd.f32 %v1363_v19, %v1355_v18 }
 0x4a4   :  { %v1373_v21 = vpop.permute.xlu1 %1372 }
 0x4a5   :  { %v1375_v25 = vadd.f32 %v1373_v21, %v1365_v20 }
 0x4a8   :  { %v1480_v26 = vpop.permute.xlu1 %1479  ;;  %s2545_s0 = spop %2544 }
 0x4a9   :  { %v1410_v27 = vstv %s2545_s0  ;;  %s2547_s7 = spop %2546  ;;  %2558 = vpush %v1480_v26  ;;  %s2800_s0 = smov 119  }
 0x4aa   :  { %v1411_v28 = vmul.f32 %v2958_v54, %v1410_v27  ;;  %v1420_v29 = vstv %s2547_s7 }
 0x4ab   :  { %v1421_v30 = vmul.f32 %v2980_v5, %v1420_v29 }
 0x4ac   :  { %1413 = vrot.lane.b32.xlu0 %v1411_v28, %s2799_s11  ;;  %s2549_s16 = spop %2548  ;;  %v1509_v39 = vpop.permute.xlu1 %1508 }
 0x4ad   :  { %1423 = vrot.lane.b32.xlu1 %v1421_v30, %s2797_s9  ;;  %v1430_v31 = vstv %s2549_s16  ;;  %s2551_s18 = spop %2550  ;;  %s2219_s16 = sld [smem:[#allocation9 + $0x7]] }
 0x4ae   :  { %v1431_v32 = vmul.f32 %v3004_v23, %v1430_v31  ;;  %v1440_v33 = vstv %s2551_s18 }
 0x4af   :  { %v1441_v34 = vmul.f32 %v3034_v53, %v1440_v33 }
 0x4b0   :  { %1433 = vrot.lane.b32.xlu0 %v1431_v32, %s2795_s19  ;;  %s2553_s22 = spop %2552  ;;  %v1529_v49 = vpop.permute.xlu1 %1528 }
 0x4b1   :  { %1443 = vrot.lane.b32.xlu1 %v1441_v34, %s2793_s3  ;;  %v1450_v35 = vstv %s2553_s22  ;;  %s2555_s26 = spop %2554 }
 0x4b2   :  { %v1451_v36 = vmul.f32 %v3066_v22, %v1450_v35  ;;  %v1460_v37 = vstv %s2555_s26 }
 0x4b3   :  { %v1461_v38 = vmul.f32 %v3104_v2, %v1460_v37 }
 0x4b4   :  { %1453 = vrot.lane.b32.xlu0 %v1451_v36, %s2791_s23  ;;  %s2557_s7 = spop %2556 }
 0x4b5   :  { %1463 = vrot.lane.b32.xlu1 %v1461_v38, %s2789_s17 }
 0x4b9   :  { %1579 = vrot.lane.b32.xlu1 %v2930_v41, %s3291_s21 }
 0x4bd   :  { %1608 = vrot.lane.b32.xlu1 %v2942_v45, %s2800_s0  ;;  %v1549_v45 = vpop.permute.xlu1 %1548 }
 0x4c1   :  { %1628 = vrot.lane.b32.xlu1 %v2969_v59, %s2800_s0  ;;  %v1569_v56 = vpop.permute.xlu1 %1568 }
 0x4c5   :  { %1648 = vrot.lane.b32.xlu1 %v3024_v40, %s2800_s0  ;;  %v1470_v40 = vstv %s2557_s7 }
 0x4c9   :  { %1668 = vrot.lane.b32.xlu1 %v3092_v57, %s2800_s0  ;;  %v1405_v57 = vstv %s2219_s16 }
 0x4ca   :  { %v1406_v58 = vadd.f32 %v1405_v57, %v2939_v43 }
 0x4da   :  { %s3156_s18 = spop %2558 }
 0x4f4   :  { %v1383_v44 = vpop.permute.xlu0 %1382 }
 0x4f5   :  { %v1385_v47 = vadd.f32 %v1383_v44, %v1375_v25 }
 0x4f7   :  { %2637 = vtanh.f32 %v1385_v47  ;;  %v1127_v47 = vmul.f32 %v3004_v23, %v3004_v23 }
 0x4f8   :  { %v1499_v48 = vpop.permute.xlu0 %1498 }
 0x4f9   :  { %2560 = vpush %v1499_v48  ;;  %v1128_v48 = vsub.f32 1.0, %v1127_v47 }
 0x4fa   :  { %2562 = vpush %v1509_v39 }
 0x4fc   :  { %v1519_v50 = vpop.permute.xlu0 %1518 }
 0x4fd   :  { %2564 = vpush %v1519_v50  ;;  %v1129_v50 = vstv %s2988_s20  ;;  %s2801_s20 = smov 9  }
 0x4fe   :  { %2566 = vpush %v1529_v49  ;;  %v1239_v49 = vmul.f32 %v3066_v22, %v3066_v22 }
 0x500   :  { %v1539_v59 = vpop.permute.xlu0 %1538 }
 0x501   :  { %v3141_v51 = vpop.eup %2637  ;;  %2568 = vpush %v1539_v59  ;;  %v1240_v59 = vsub.f32 1.0, %v1239_v49  ;;  %v1088_v49 = vstv %s2961_s14  ;;  %s3292_s14 = smov 120  }
 0x502   :  { %2570 = vpush %v1549_v45  ;;  %v1471_v52 = vmul.f32 %v3141_v51, %v1470_v40  ;;  %v1130_v45 = vmul.f32 %v1129_v50, %v1128_v48  ;;  %v1391_v40 = vmul.f32 %v3141_v51, %v3141_v51  ;;  %v1178_v48 = vmul.f32 %v3034_v53, %v3034_v53 }
 0x504   :  { %1473 = vrot.lane.b32.xlu0 %v1471_v52, %s2788_s15  ;;  %v1559_v55 = vpop.permute.xlu0 %1558  ;;  %v1241_v52 = vstv %s3045_s13 }
 0x505   :  { %2572 = vpush %v1559_v55 }
 0x506   :  { %2574 = vpush %v1569_v56  ;;  %v1131_v56 = vadd.f32 1.0, %v1130_v45 }
 0x508   :  { %1598 = vrot.lane.b32.xlu0 %v2932_v42, %s2800_s0 }
 0x50c   :  { %1618 = vrot.lane.b32.xlu0 %v2949_v46, %s2800_s0 }
 0x510   :  { %1638 = vrot.lane.b32.xlu0 %v2995_v12, %s2800_s0 }
 0x514   :  { %1658 = vrot.lane.b32.xlu0 %v3056_v13, %s2800_s0 }
 0x518   :  { %1678 = vrot.lane.b32.xlu0 %v2930_v41, %s2800_s0 }
 0x51e   :  { %v1414_v60 = vpop.permute.xlu0 %1413 }
 0x51f   :  { %v1424_v61 = vpop.permute.xlu1 %1423  ;;  %v1416_v62 = vadd.f32 %v1414_v60, %v1406_v58  ;;  %v1242_v60 = vmul.f32 %v1241_v52, %v1240_v59  ;;  %v1179_v59 = vsub.f32 1.0, %v1178_v48 }
 0x521   :  { %v1426_v42 = vadd.f32 %v1424_v61, %v1416_v62  ;;  %v1392_v61 = vsub.f32 1.0, %v1391_v40  ;;  %v1310_v40 = vmul.f32 %v3104_v2, %v3104_v2 }
 0x522   :  { %v1434_v63 = vpop.permute.xlu0 %1433 }
 0x523   :  { %v1444_v0 = vpop.permute.xlu1 %1443  ;;  %v1436_v46 = vadd.f32 %v1434_v63, %v1426_v42  ;;  %v1393_v42 = vstv %s3117_s27 }
 0x525   :  { %v1446_v1 = vadd.f32 %v1444_v0, %v1436_v46  ;;  %v1132_v0 = vand.u32 2147483647, %v1131_v56  ;;  %v1180_v56 = vstv %s3015_s30 }
 0x526   :  { %v1454_v3 = vpop.permute.xlu0 %1453 }
 0x527   :  { %v1464_v12 = vpop.permute.xlu1 %1463  ;;  %v1456_v4 = vadd.f32 %v1454_v3, %v1446_v1  ;;  %v1243_v3 = vadd.f32 1.0, %v1242_v60  ;;  %v1181_v60 = vmul.f32 %v1180_v56, %v1179_v59 }
 0x529   :  { %v1466_v13 = vadd.f32 %v1464_v12, %v1456_v4  ;;  %v1394_v12 = vmul.f32 %v1393_v42, %v1392_v61  ;;  %v1311_v61 = vsub.f32 1.0, %v1310_v40 }
 0x52a   :  { %s2561_s22 = spop %2560 }
 0x52b   :  { %v1580_v6 = vpop.permute.xlu1 %1579  ;;  %v1501_v7 = vstv %s2561_s22  ;;  %s2563_s26 = spop %2562 }
 0x52c   :  { %v1511_v8 = vstv %s2563_s26  ;;  %2576 = vpush %v1580_v6  ;;  %v1502_v9 = vmul.f32 %v2958_v54, %v1501_v7 }
 0x52d   :  { %v1512_v10 = vmul.f32 %v2980_v5, %v1511_v8  ;;  %v1244_v8 = vand.u32 2147483647, %v1243_v3 }
 0x52e   :  { %1504 = vrot.lane.b32.xlu1 %v1502_v9, %s2778_s29  ;;  %s2565_s7 = spop %2564  ;;  %v1395_v9 = vadd.f32 1.0, %v1394_v12 }
 0x52f   :  { %1514 = vrot.lane.b32.xlu0 %v1512_v10, %s2799_s11  ;;  %v1521_v11 = vstv %s2565_s7  ;;  %s2567_s16 = spop %2566  ;;  %v1609_v27 = vpop.permute.xlu1 %1608 }
 0x530   :  { %v1522_v14 = vmul.f32 %v3004_v23, %v1521_v11  ;;  %v1531_v15 = vstv %s2567_s16 }
 0x531   :  { %v1532_v17 = vmul.f32 %v3034_v53, %v1531_v15 }
 0x532   :  { %1524 = vrot.lane.b32.xlu1 %v1522_v14, %s2797_s9  ;;  %s2569_s22 = spop %2568 }
 0x533   :  { %1534 = vrot.lane.b32.xlu0 %v1532_v17, %s2795_s19  ;;  %v1541_v18 = vstv %s2569_s22  ;;  %s2571_s26 = spop %2570  ;;  %v1629_v31 = vpop.permute.xlu1 %1628  ;;  %v1396_v17 = vand.u32 2147483647, %v1395_v9 }
 0x534   :  { %v1542_v19 = vmul.f32 %v3066_v22, %v1541_v18  ;;  %v1551_v20 = vstv %s2571_s26 }
 0x535   :  { %v1552_v21 = vmul.f32 %v3104_v2, %v1551_v20  ;;  %v1689_v20 = vrot.slane %v2930_v41, 1 }
 0x536   :  { %1544 = vrot.lane.b32.xlu1 %v1542_v19, %s2793_s3  ;;  %s2573_s7 = spop %2572 }
 0x537   :  { %1554 = vrot.lane.b32.xlu0 %v1552_v21, %s2791_s23  ;;  %v1561_v25 = vstv %s2573_s7  ;;  %s2575_s16 = spop %2574  ;;  %v1649_v33 = vpop.permute.xlu1 %1648 }
 0x538   :  { %v1562_v26 = vmul.f32 %v3141_v51, %v1561_v25  ;;  %v1571_v36 = vstv %s2575_s16 }
 0x53a   :  { %1564 = vrot.lane.b32.xlu1 %v1562_v26, %s2789_s17 }
 0x53b   :  { %v1669_v39 = vpop.permute.xlu1 %1668 }
 0x55d   :  { %s3183_s22 = spop %2576 }
 0x576   :  { %v1474_v28 = vpop.permute.xlu0 %1473 }
 0x577   :  { %v1476_v29 = vadd.f32 %v1474_v28, %v1466_v13 }
 0x579   :  { %2639 = vtanh.f32 %v1476_v29 }
 0x57a   :  { %v1599_v30 = vpop.permute.xlu0 %1598  ;;  %2641 = vlog2.f32 %v1132_v0 }
 0x57b   :  { %2578 = vpush %v1599_v30  ;;  %2643 = vlog2.f32 %v1244_v8 }
 0x57c   :  { %2580 = vpush %v1609_v27  ;;  %2645 = vlog2.f32 %v1396_v17  ;;  %v1707_v17 = vsel %vm1706_vm3, %v2958_v54, %v2980_v5 }
 0x57e   :  { %v1619_v32 = vpop.permute.xlu0 %1618 }
 0x57f   :  { %2582 = vpush %v1619_v32 }
 0x580   :  { %2584 = vpush %v1629_v31 }
 0x582   :  { %v1639_v34 = vpop.permute.xlu0 %1638 }
 0x583   :  { %v3172_v35 = vpop.eup %2639  ;;  %2586 = vpush %v1639_v34 }
 0x584   :  { %2588 = vpush %v1649_v33  ;;  %v1572_v37 = vmul.f32 %v3172_v35, %v1571_v36  ;;  %v2642_v19 = vpop.eup %2641 }
 0x585   :  { %v1134_v21 = vmul.f32 0.6931472, %v2642_v19  ;;  %v2644_v25 = vpop.eup %2643 }
 0x586   :  { %1574 = vrot.lane.b32.xlu0 %v1572_v37, %s2788_s15  ;;  %v1659_v38 = vpop.permute.xlu0 %1658  ;;  %v1246_v26 = vmul.f32 0.6931472, %v2644_v25  ;;  %v2646_v27 = vpop.eup %2645  ;;  %v1086_v37 = vmul.f32 %v2980_v5, %v2980_v5 }
 0x587   :  { %2590 = vpush %v1659_v38  ;;  %v1398_v28 = vmul.f32 0.6931472, %v2646_v27 }
 0x588   :  { %2592 = vpush %v1669_v39  ;;  %v1087_v47 = vsub.f32 1.0, %v1086_v37 }
 0x58a   :  { %v1679_v44 = vpop.permute.xlu0 %1678  ;;  %v1089_v45 = vmul.f32 %v1088_v49, %v1087_v47 }
 0x58b   :  { %2594 = vpush %v1679_v44 }
 0x5a0   :  { %v1505_v30 = vpop.permute.xlu1 %1504 }
 0x5a1   :  { %v1515_v32 = vpop.permute.xlu0 %1514 }
 0x5a4   :  { %v1525_v34 = vpop.permute.xlu1 %1524 }
 0x5a5   :  { %v1535_v38 = vpop.permute.xlu0 %1534 }
 0x5a8   :  { %v1545_v44 = vpop.permute.xlu1 %1544 }
 0x5a9   :  { %v1555_v52 = vpop.permute.xlu0 %1554 }
 0x5ac   :  { %s2579_s26 = spop %2578 }
 0x5ad   :  { %v1601_v55 = vstv %s2579_s26  ;;  %s2581_s7 = spop %2580 }
 0x5ae   :  { %v1602_v57 = vmul.f32 %v2958_v54, %v1601_v55  ;;  %v1611_v58 = vstv %s2581_s7 }
 0x5af   :  { %v1612_v62 = vmul.f32 %v2980_v5, %v1611_v58  ;;  %v1090_v58 = vadd.f32 1.0, %v1089_v45 }
 0x5b0   :  { %1604 = vrot.lane.b32.xlu1 %v1602_v57, %s2801_s20  ;;  %s2583_s16 = spop %2582  ;;  %v1565_v57 = vpop.permute.xlu1 %1564 }
 0x5b1   :  { %1614 = vrot.lane.b32.xlu0 %v1612_v62, %s2778_s29  ;;  %v1621_v63 = vstv %s2583_s16  ;;  %s2585_s21 = spop %2584  ;;  %v1482_v62 = vmul.f32 %v3172_v35, %v3172_v35  ;;  %v1091_v3 = vand.u32 2147483647, %v1090_v58 }
 0x5b2   :  { %v1622_v46 = vmul.f32 %v3004_v23, %v1621_v63  ;;  %v1631_v1 = vstv %s2585_s21  ;;  %v2665_v63 = vld [vmem:[#allocation8 + $0x8] sm:$0x3] }
 0x5b3   :  { %v1632_v4 = vmul.f32 %v3034_v53, %v1631_v1  ;;  %v3218_v0 = vsel %vm1727_vm2, %v2665_v63, 0 }
 0x5b4   :  { %1624 = vrot.lane.b32.xlu1 %v1622_v46, %s2799_s11  ;;  %s2587_s13 = spop %2586  ;;  %v1312_v46 = vstv %s3079_s6  ;;  %v1734_v9 = vand.u32 4294901760, %v3218_v0 }
 0x5b5   :  { %1634 = vrot.lane.b32.xlu0 %v1632_v4, %s2797_s9  ;;  %v1641_v13 = vstv %s2587_s13  ;;  %s2589_s26 = spop %2588  ;;  %v1182_v4 = vadd.f32 1.0, %v1181_v60 }
 0x5b6   :  { %v1642_v6 = vmul.f32 %v3066_v22, %v1641_v13  ;;  %v1651_v7 = vstv %s2589_s26  ;;  %v1313_v13 = vmul.f32 %v1312_v46, %v1311_v61 }
 0x5b7   :  { %v1652_v10 = vmul.f32 %v3104_v2, %v1651_v7  ;;  %v2666_v7 = vld [vmem:[#allocation8] sm:$0xff] }
 0x5b8   :  { %1644 = vrot.lane.b32.xlu1 %v1642_v6, %s2795_s19  ;;  %s2591_s29 = spop %2590  ;;  %v1483_v6 = vsub.f32 1.0, %v1482_v62  ;;  %v1731_v8 = vand.u32 4294901760, %v2666_v7 }
 0x5b9   :  { %1654 = vrot.lane.b32.xlu0 %v1652_v10, %s2793_s3  ;;  %v1661_v11 = vstv %s2591_s29  ;;  %s2593_s21 = spop %2592  ;;  %v1484_v10 = vstv %s3156_s18 }
 0x5ba   :  { %v1662_v14 = vmul.f32 %v3141_v51, %v1661_v11  ;;  %v1671_v15 = vstv %s2593_s21  ;;  %v1183_v11 = vand.u32 2147483647, %v1182_v4  ;;  %v3227_v19 = vsub.f32 %v2666_v7, %v1731_v8 }
 0x5bb   :  { %v1672_v18 = vmul.f32 %v3172_v35, %v1671_v15  ;;  %v1485_v15 = vmul.f32 %v1484_v10, %v1483_v6 }
 0x5bc   :  { %1664 = vrot.lane.b32.xlu1 %v1662_v14, %s2791_s23  ;;  %s2220_s23 = sld [smem:[#allocation9 + $0x8]]  ;;  %v1314_v14 = vadd.f32 1.0, %v1313_v13 }
 0x5bd   :  { %1674 = vrot.lane.b32.xlu0 %v1672_v18, %s2789_s17  ;;  %v1709_v18 = vsel %vm1708_vm4, %v1707_v17, %v3004_v23  ;;  %v1810_v23 = vand.u32 4294901760, %v3227_v19  ;;  %s2802_s17 = smov [#allocation10]  }
 0x5be   :  { %v1315_v25 = vand.u32 2147483647, %v1314_v14 }
 0x5c1   :  { %1690 = vrot.lane.b32.xlu0 %v1689_v20, %s2800_s0  ;;  %v3230_v20 = vsub.f32 %v3218_v0, %v1734_v9 }
 0x5c2   :  { %v1496_v29 = vstv %s2220_s23 }
 0x5c3   :  { %v1497_v31 = vadd.f32 %v1496_v29, %v2939_v43  ;;  %v2457_v56 = vpack.c.bf16 %v3230_v20, %v3227_v19 }
 0x5c5   :  { %1136 = vrot.lane.b32.xlu0 %v1134_v21, %s2785_s2  ;;  %v1507_v41 = vadd.f32 %v1505_v30, %v1497_v31  ;;  %v1711_v21 = vsel %vm1710_vm5, %v1709_v18, %v3034_v53  ;;  %s2595_s2 = spop %2594 }
 0x5c6   :  { %v1713_v27 = vsel %vm1712_vm6, %v1711_v21, %v3066_v22  ;;  %v1681_v30 = vstv %s2595_s2 }
 0x5c7   :  { %v1517_v33 = vadd.f32 %v1515_v32, %v1507_v41  ;;  %v1715_v5 = vsel %vm1714_vm7, %v1713_v27, %v3104_v2 }
 0x5c8   :  { %v1717_v29 = vsel %vm1716_vm8, %v1715_v5, %v3141_v51 }
 0x5c9   :  { %1248 = vrot.lane.b32.xlu0 %v1246_v26, %s2790_s1  ;;  %v1527_v36 = vadd.f32 %v1525_v34, %v1517_v33  ;;  %v1486_v26 = vadd.f32 1.0, %v1485_v15  ;;  %v1719_v41 = vsel %vm1718_vm9, %v1717_v29, %v3172_v35  ;;  %v1811_v34 = vsub.f32 %v3227_v19, %v1810_v23  ;;  %s2198_s1 = sshll.u32 %s2802_s17, 4  ;;  %s2199_s1 = int_to_ptr.vmem [resolvable:$true] %s2198_s1 }
 0x5ca   :  { %p2751_p2 = scmp.lt.s32.totalorder %s2199_s1, %s2199_s1 }
 0x5cb   :  { %v1537_v39 = vadd.f32 %v1535_v38, %v1527_v36  ;;  %v1487_v31 = vand.u32 2147483647, %v1486_v26  ;;  %v1812_v51 = vand.u32 4294901760, %v1811_v34 }
 0x5cd   :  { %1400 = vrot.lane.b32.xlu0 %v1398_v28, %s2794_s8  ;;  %v1547_v50 = vadd.f32 %v1545_v44, %v1537_v39  ;;  %v1817_v28 = vand.u32 4294901760, %v3230_v20  ;;  %v1584_v39 = vstv %s3183_s22 }
 0x5cf   :  { %v1557_v55 = vadd.f32 %v1555_v52, %v1547_v50  ;;  %v1818_v2 = vsub.f32 %v3230_v20, %v1817_v28  ;;  %v2451_v50 = vpack.c.bf16 %v1734_v9, %v1731_v8  ;;  %v2463_v58 = vpack.c.bf16 %v1817_v28, %v1810_v23 }
 0x5d1   :  { %v1567_v42 = vadd.f32 %v1565_v57, %v1557_v55  ;;  %v1819_v38 = vand.u32 4294901760, %v1818_v2  ;;  %2452 = vmatpush3.bf16.msra.mxu0 %v2451_v50  ;;  %v1061_v2 = vstv %s2956_s12 }
 0x5d2   :  { %2456 = vmatprep.subr.bf16.mxu0 %v2782_v16 }
 0x5d3   :  { %v2454_v48 = vpack.c.bf16 %v1819_v38, %v1812_v51 }
 0x5d5   :  { %2455 = vmatpush3.bf16.msra.mxu1 %v2454_v48 }
 0x5d6   :  { %2459 = vmatprep.subr.bf16.mxu1 %v2782_v16 }
 0x5f8   :  { %v1575_v1 = vpop.permute.xlu0 %1574 }
 0x5f9   :  { %v1577_v12 = vadd.f32 %v1575_v1, %v1567_v42 }
 0x5fb   :  { %2647 = vtanh.f32 %v1577_v12 }
 0x5fc   :  { %2649 = vlog2.f32 %v1091_v3 }
 0x5fd   :  { %2651 = vlog2.f32 %v1183_v11 }
 0x5fe   :  { %2653 = vlog2.f32 %v1315_v25 }
 0x5ff   :  { %2655 = vlog2.f32 %v1487_v31 }
 0x605   :  { %v2648_v53 = vpop.eup %2647 }
 0x606   :  { %v2650_v32 = vpop.eup %2649  ;;  %v1682_v33 = vmul.f32 %v2648_v53, %v1681_v30  ;;  %v1582_v22 = vmul.f32 %v2648_v53, %v2648_v53  ;;  %v1721_v36 = vsel %vm1720_vm10, %v1719_v41, %v2648_v53 }
 0x607   :  { %v1093_v44 = vmul.f32 0.6931472, %v2650_v32  ;;  %v2652_v49 = vpop.eup %2651 }
 0x608   :  { %1684 = vrot.lane.b32.xlu1 %v1682_v33, %s2788_s15  ;;  %v1583_v37 = vsub.f32 1.0, %v1582_v22  ;;  %v1185_v45 = vmul.f32 0.6931472, %v2652_v49  ;;  %v2654_v40 = vpop.eup %2653  ;;  %v1059_v22 = vmul.f32 %v2958_v54, %v2958_v54 }
 0x609   :  { %v1317_v52 = vmul.f32 0.6931472, %v2654_v40  ;;  %v2656_v55 = vpop.eup %2655 }
 0x60a   :  { %v1585_v47 = vmul.f32 %v1584_v39, %v1583_v37  ;;  %v1489_v57 = vmul.f32 0.6931472, %v2656_v55  ;;  %v1060_v34 = vsub.f32 1.0, %v1059_v22 }
 0x60c   :  { %1095 = vrot.lane.b32.xlu1 %v1093_v44, %s2786_s28  ;;  %v1586_v35 = vadd.f32 1.0, %v1585_v47  ;;  %s2221_s28 = sld [smem:[#allocation9 + $0x9]] }
 0x60e   :  { %v1587_v59 = vand.u32 2147483647, %v1586_v35 }
 0x610   :  { %1187 = vrot.lane.b32.xlu1 %v1185_v45, %s2787_s10  ;;  %2657 = vlog2.f32 %v1587_v59 }
 0x612   :  { %v1596_v62 = vstv %s2221_s28 }
 0x613   :  { %v1597_v42 = vadd.f32 %v1596_v62, %v2939_v43 }
 0x614   :  { %1319 = vrot.lane.b32.xlu1 %v1317_v52, %s2792_s24 }
 0x618   :  { %1491 = vrot.lane.b32.xlu1 %v1489_v57, %s2796_s25 }
 0x61a   :  { %v2658_v60 = vpop.eup %2657 }
 0x61b   :  { %v1589_v61 = vmul.f32 0.6931472, %v2658_v60 }
 0x61d   :  { %1591 = vrot.lane.b32.xlu0 %v1589_v61, %s3292_s14 }
 0x622   :  { %v1605_v63 = vpop.permute.xlu1 %1604 }
 0x623   :  { %v1607_v0 = vadd.f32 %v1605_v63, %v1597_v42  ;;  %v1615_v46 = vpop.permute.xlu0 %1614 }
 0x625   :  { %v1617_v1 = vadd.f32 %v1615_v46, %v1607_v0 }
 0x626   :  { %v1625_v3 = vpop.permute.xlu1 %1624 }
 0x627   :  { %v1627_v12 = vadd.f32 %v1625_v3, %v1617_v1  ;;  %v1635_v4 = vpop.permute.xlu0 %1634 }
 0x629   :  { %v1637_v13 = vadd.f32 %v1635_v4, %v1627_v12 }
 0x62a   :  { %v1645_v6 = vpop.permute.xlu1 %1644 }
 0x62b   :  { %v1647_v7 = vadd.f32 %v1645_v6, %v1637_v13  ;;  %v1655_v8 = vpop.permute.xlu0 %1654 }
 0x62d   :  { %v1657_v9 = vadd.f32 %v1655_v8, %v1647_v7 }
 0x62e   :  { %v1665_v10 = vpop.permute.xlu1 %1664 }
 0x62f   :  { %v1667_v11 = vadd.f32 %v1665_v10, %v1657_v9  ;;  %v1675_v14 = vpop.permute.xlu0 %1674 }
 0x631   :  { %v1677_v15 = vadd.f32 %v1675_v14, %v1667_v11  ;;  %v2667_v14 = vld [vmem:[#allocation2] sm:$0xff] }
 0x633   :  { %v1691_v17 = vpop.permute.xlu0 %1690 }
 0x634   :  { %2596 = vpush %v1691_v17 }
 0x637   :  { %v1137_v47 = vpop.permute.xlu0 %1136 }
 0x63b   :  { %v1249_v35 = vpop.permute.xlu0 %1248 }
 0x63f   :  { %v1401_v40 = vpop.permute.xlu0 %1400 }
 0x665   :  { %s2597_s10 = spop %2596 }
 0x666   :  { %v1695_v5 = vstv %s2597_s10 }
 0x67a   :  { %v1685_v18 = vpop.permute.xlu1 %1684 }
 0x67b   :  { %v1687_v43 = vadd.f32 %v1685_v18, %v1677_v15 }
 0x67d   :  { %2659 = vtanh.f32 %v1687_v43 }
 0x67e   :  { %v1096_v38 = vpop.permute.xlu1 %1095 }
 0x682   :  { %v1188_v48 = vpop.permute.xlu1 %1187 }
 0x686   :  { %v1320_v45 = vpop.permute.xlu1 %1319 }
 0x687   :  { %v2660_v19 = vpop.eup %2659 }
 0x688   :  { %v1693_v20 = vmul.f32 %v2660_v19, %v2660_v19  ;;  %v1723_v21 = vsel %vm1722_vm11, %v1721_v36, %v2660_v19  ;;  %v1062_v36 = vmul.f32 %v1061_v2, %v1060_v34 }
 0x689   :  { %v1725_v25 = vsel %vm77_vm0, %v1723_v21, 0 }
 0x68a   :  { %v1694_v26 = vsub.f32 1.0, %v1693_v20  ;;  %v1797_v27 = vand.u32 4294901760, %v1725_v25  ;;  %v1063_v37 = vadd.f32 1.0, %v1062_v36  ;;  %v1492_v52 = vpop.permute.xlu1 %1491 }
 0x68c   :  { %v1798_v23 = vsub.f32 %v1725_v25, %v1797_v27  ;;  %2378 = vmatmul.mubr.f32.vlgmr.msra.gmra.mrb[2].mxu1 %v1797_v27  ;;  %v1696_v28 = vmul.f32 %v1695_v5, %v1694_v26  ;;  %v1064_v51 = vand.u32 2147483647, %v1063_v37 }
 0x68d   :  { %2461 = vmatpush3.bf16.msra.mxu1 %v2451_v50  ;;  %2391 = vmatprep.mubr.msk.f32.mxu1 %vm2783_vm1, %v2784_v24 }
 0x68e   :  { %v1799_v29 = vand.u32 4294901760, %v1798_v23  ;;  %2465 = vmatprep.subr.bf16.mxu1 %v2782_v16  ;;  %v1697_v53 = vadd.f32 1.0, %v1696_v28 }
 0x68f   :  { %v1592_v55 = vpop.permute.xlu0 %1591 }
 0x690   :  { %2392 = vmatmul.mubr.f32.vlgmr.msra.gmra.mrb[4].mxu1 %v1799_v29  ;;  %v1800_v30 = vsub.f32 %v1798_v23, %v1799_v29  ;;  %v1698_v31 = vand.u32 2147483647, %v1697_v53 }
 0x691   :  { %2467 = vmatpush3.bf16.msra.mxu1 %v2451_v50  ;;  %2405 = vmatprep.mubr.msk.f32.mxu1 %vm2783_vm1, %v2784_v24 }
 0x692   :  { %v1801_v41 = vand.u32 4294901760, %v1800_v30  ;;  %2661 = vlog2.f32 %v1698_v31 }
 0x693   :  { %2663 = vlog2.f32 %v1064_v51 }
 0x694   :  { %2371 = vmatmul.mubr.f32.vlgmr.msra.gmra.mrb[2].mxu0 %v1801_v41  ;;  %2406 = vmatmul.mubr.f32.vlgmr.msra.gmra.mrb[6].mxu1 %v1797_v27 }
 0x695   :  { %2458 = vmatpush3.bf16.msra.mxu0 %v2457_v56  ;;  %2384 = vmatprep.mubr.msk.f32.mxu0 %vm2783_vm1, %v2784_v24 }
 0x696   :  { %2462 = vmatprep.subr.bf16.mxu0 %v2782_v16 }
 0x698   :  { %2385 = vmatmul.mubr.f32.vlgmr.msra.gmra.mrb[4].mxu0 %v1798_v23 }
 0x699   :  { %2464 = vmatpush3.bf16.msra.mxu0 %v2463_v58  ;;  %2398 = vmatprep.mubr.msk.f32.mxu0 %vm2783_vm1, %v2784_v24 }
 0x69c   :  { %v2662_v32 = vpop.eup %2661  ;;  %2399 = vmatmul.mubr.f32.vlgmr.msra.gmra.mrb[6].mxu0 %v1797_v27 }
 0x69d   :  { %v1700_v33 = vmul.f32 0.6931472, %v2662_v32  ;;  %v2664_v16 = vpop.eup %2663 }
 0x69e   :  { %v1066_v39 = vmul.f32 0.6931472, %v2664_v16 }
 0x69f   :  { %1702 = vrot.lane.b32.xlu1 %v1700_v33, %s2800_s0 }
 0x6a0   :  { %v1098_v44 = vadd.f32 %v1096_v38, %v1066_v39 }
 0x6a2   :  { %v1139_v24 = vadd.f32 %v1137_v47, %v1098_v44 }
 0x6a4   :  { %v1190_v49 = vadd.f32 %v1188_v48, %v1139_v24 }
 0x6a6   :  { %v1251_v50 = vadd.f32 %v1249_v35, %v1190_v49 }
 0x6a8   :  { %v1322_v59 = vadd.f32 %v1320_v45, %v1251_v50 }
 0x6aa   :  { %v1403_v54 = vadd.f32 %v1401_v40, %v1322_v59 }
 0x6ac   :  { %v1494_v56 = vadd.f32 %v1492_v52, %v1403_v54 }
 0x6ae   :  { %v1594_v57 = vadd.f32 %v1592_v55, %v1494_v56 }
 0x711   :  { %v1703_v58 = vpop.permute.xlu1 %1702 }
 0x712   :  { %v1705_v60 = vadd.f32 %v1703_v58, %v1594_v57 }
 0x714   :  { %2191 = vst.msk [vmem:[%s3290_s5] sm:$0xff] %vm1706_vm3, %v1705_v60  ;;  %s2746_s5 = scalar_lea.vmem %s2199_s1, 128 }
 0x715   :  { %p2747_p1 = scmp.ne.s32.totalorder %s2199_s1, %s2746_s5  ;;  %p2752_p3 = scmp.lt.s32.totalorder %s2746_s5, %s2746_s5 }
 0x717   :  { %p2753_p4 = por %p2752_p3, %p2751_p2 }
 0x719   :  { %p2754_p5 = pnand %p2753_p4, %p2747_p1 }
 0x75f   :  { %v1884_v61 = vpop.f32.mrb[2].mxu1 }
 0x760   :  { %v2379_v62 = vpop.f32.mrb[3].mxu1 }
 0x763   :  { %v2035_v42 = vpop.f32.mrb[4].mxu1 }
 0x764   :  { %v2393_v63 = vpop.f32.mrb[5].mxu1 }
 0x767   :  { %v1803_v0 = vpop.f32.mrb[2].mxu0  ;;  %v2185_v46 = vpop.f32.mrb[6].mxu1 }
 0x768   :  { %v1885_v1 = vadd.f32 %v1884_v61, %v1803_v0  ;;  %v2372_v3 = vpop.f32.mrb[3].mxu0  ;;  %v2407_v12 = vpop.f32.mrb[7].mxu1 }
 0x76b   :  { %v1960_v4 = vpop.f32.mrb[4].mxu0 }
 0x76c   :  { %v1961_v13 = vadd.f32 %v1960_v4, %v1885_v1  ;;  %v2386_v6 = vpop.f32.mrb[5].mxu0 }
 0x76e   :  { %v2036_v7 = vadd.f32 %v2035_v42, %v1961_v13 }
 0x76f   :  { %v2112_v8 = vpop.f32.mrb[6].mxu0 }
 0x770   :  { %v2113_v9 = vadd.f32 %v2112_v8, %v2036_v7  ;;  %v2400_v10 = vpop.f32.mrb[7].mxu0 }
 0x772   :  { %v2186_v11 = vadd.f32 %v2185_v46, %v2113_v9 }
 0x774   :  { %v2189_v15 = vadd.f32 %v2667_v14, %v2186_v11 }
 0x776   :  { %2190 = vst.msk [vmem:[#allocation10] sm:$0xff] %vm77_vm0, %v2189_v15 }
 0x777   :  { %2757 = shalt.err (!%p2754_p5)
}
 0x778   :  { %s2758_s3 = scalar_lea.hbm %s3289_s4, 128 }
 0x779   :  { %p2759_p6 = scmp.ne.s32.totalorder %s3289_s4, %s2758_s3  ;;  %p2762_p7 = scmp.lt.u32.totalorder %s2758_s3, %s3289_s4 }
 0x77b   :  { %p2764_p8 = pnand %p2762_p7, %p2759_p6 }
 0x77d   :  { %2767 = shalt.err (!%p2764_p8)
}
 0x77e   :  { %2201 = dma.vmem_to_hbm [thread:$0]  %s2199_s1, 128, %s3289_s4, [#allocation4]  }
 0x77f   :  { %2774 = dma.done.wait [#allocation4], 128  }
 0x780   :  { %2775 = vsyncadd [#allocation4], 4294967168 }
 0x781   :  { %2209 = vsyncpa [#allocation3], 1 }
 0x782   :  { %2210 = vsyncpa [#allocation7], 1 }
 0x783   :  { %2211 = vsyncpa [#allocation4], 1 }
 0x784   :  { %2212 = vsyncpa [#allocation5], 1 }

</bundles_post_ra>
